<compile_context>
chip_gen: v7x
topology: tpu7x:2x2x1
jax: 0.10.0
libtpu: 0.0.40
codegen_flags: <defaults>
</compile_context>

<pallas_src>
import numpy as np
import jax
import jax.numpy as jnp
from jax.experimental import pallas as pl
from jax.experimental.pallas import tpu as pltpu


# ----------------------------------------------------------------------------
# Config (mirrors the missing `Config` from vae/model.py)
# ----------------------------------------------------------------------------
class Config:
    in_channels = 3
    encoder_channels = (8, 16, 32)
    kernel_size = 3
    latent_dim = 16
    image_size = 32          # 3 stride-2 convs: 32 -> 16 -> 8 -> 4  (=> 4*4 in Linear)


BN_EPS = 1e-5
# bf16 MXU operands (native MXU path; the v5e MXU is bf16-only anyway).
# Accumulation and BatchNorm statistics remain f32.
MXU_DTYPE = jnp.bfloat16

_VMEM = pl.BlockSpec(memory_space=pltpu.MemorySpace.VMEM)


# ----------------------------------------------------------------------------
# In-kernel building blocks
# ----------------------------------------------------------------------------
def _conv_bn_relu(x, w_eo, w_up, pool, gb):
    """One stride-2 3x3 conv + training-mode BatchNorm + ReLU.

    x    : (H, N, W*Cin)        activation, lane index = w*Cin + cin
    w_eo : (2*W*Cin, W2*Cout)   kernel rows 1 (even) and 2 (odd), row-stacked;
                                column taps + width padding folded in.
    w_up : (W*Cin, W2*Cout)     kernel row 0 ("up" tap).
    pool : (W2*Cout, W2*Cout)   per-channel mean-pool / broadcast projector
    gb   : (2, W2*Cout)         row 0 = gamma, row 1 = beta (lane-expanded)
    Returns (H2*N, W2*Cout) f32 with rows ordered (h_out, n).
    """
    H, N, WC = x.shape
    H2 = H // 2
    M = H2 * N
    OUT = w_eo.shape[1]

    # Split H into (pair, parity): padded input row 2a + i - 1 <-> tap i.
    xs = x.reshape(H2, 2, N, WC)
    even = xs[:, 0]                        # input row 2a      (tap i = 1)
    odd = xs[:, 1]                         # input row 2a + 1  (tap i = 2)

    # Taps 1 + 2 fused into ONE matmul: lane-concat the activations and
    # row-stack the two tap weight matrices (contraction dim = 2*WC).
    eo = jnp.concatenate([even, odd], axis=-1).reshape(M, 2 * WC)
    t12 = jnp.dot(eo.astype(MXU_DTYPE), w_eo,
                  preferred_element_type=jnp.float32)           # (M, OUT)

    # Tap 0 uses the PREVIOUS output row's odd input row (2a - 1): compute the
    # matmul on `odd` once and shift the (M, OUT) partial down by one h-row
    # (zero-fill the first) instead of materializing a shifted activation copy.
    t0 = jnp.dot(odd.reshape(M, WC).astype(MXU_DTYPE), w_up,
                 preferred_element_type=jnp.float32)            # (M, OUT)
    t0 = t0.reshape(H2, N, OUT)
    t0 = jnp.concatenate(
        [jnp.zeros((1, N, OUT), jnp.float32), t0[: H2 - 1]], axis=0)

    y = t12 + t0.reshape(M, OUT)                                # conv output

    # BatchNorm over (N, H_out, W_out) per channel, single pass in f32.  Rows
    # cover (h_out, n); the W_out groups packed in the lane dim are pooled and
    # the per-channel result broadcast back to lanes by the constant `pool`
    # matmul.  The mean / mean-of-squares poolings share ONE matmul.
    inv_m = 1.0 / M
    stats = jnp.concatenate(
        [jnp.sum(y, axis=0, keepdims=True),
         jnp.sum(y * y, axis=0, keepdims=True)], axis=0) * inv_m   # (2, OUT)
    pooled = jnp.dot(stats, pool, preferred_element_type=jnp.float32)
    mean = pooled[0:1, :]
    var = pooled[1:2, :] - mean * mean                          # biased (PyTorch)
    scale = gb[0:1, :] * jax.lax.rsqrt(var + BN_EPS)
    shift = gb[1:2, :] - mean * scale
    return jnp.maximum(y * scale + shift, 0.0)


def encoder_kernel(x_ref, weo1_ref, wup1_ref, weo2_ref, wup2_ref,
                   weo3_ref, wup3_ref, p1_ref, p2_ref, p3_ref,
                   gb1_ref, gb2_ref, gb3_ref, wh_ref, bh_ref, o_ref):
    n = x_ref.shape[1]

    y = _conv_bn_relu(x_ref[...], weo1_ref[...], wup1_ref[...],
                      p1_ref[...], gb1_ref[...])
    y = _conv_bn_relu(y.reshape(y.shape[0] // n, n, y.shape[1]),
                      weo2_ref[...], wup2_ref[...], p2_ref[...], gb2_ref[...])
    y = _conv_bn_relu(y.reshape(y.shape[0] // n, n, y.shape[1]),
                      weo3_ref[...], wup3_ref[...], p3_ref[...], gb3_ref[...])

    # Heads: flatten + mu/logvar as ONE matmul.  The NCHW flatten order is
    # pre-baked into wh's rows; the h_out groups of the conv3 output are
    # lane-concatenated (each piece is a full 128-lane slab, so the concat is
    # vreg copies only) -> lhs is (N, H3*W3*C2) = (N, 512).
    h3 = y.shape[0] // n
    y3 = y.reshape(h3, n, y.shape[1])
    yt = jnp.concatenate([y3[a] for a in range(h3)], axis=-1)
    o_ref[...] = (jnp.dot(yt.astype(MXU_DTYPE), wh_ref[...],
                          preferred_element_type=jnp.float32) + bh_ref[...])


# ----------------------------------------------------------------------------
# Trace-time weight / constant preparation (all constant-sized, batch-free)
# ----------------------------------------------------------------------------
def _row_tap_weights(w_oihw, w_in):
    """PyTorch (Cout,Cin,3,3) conv weight -> (3, w_in*Cin, (w_in//2)*Cout).

    wr[i][(w, cin), (w2, cout)] = W[cout, cin, i, w - 2*w2 + 1] (0 outside the
    3x3 footprint): the column taps and the width padding of the stride-2 /
    pad-1 conv are folded into a constant matrix so the kernel only needs one
    lane-dense matmul per kernel row."""
    cout, cin, kh, kw = w_oihw.shape
    assert kh == 3 and kw == 3, "kernel assumes Config.kernel_size == 3"
    w_out = w_in // 2
    sel = np.zeros((kw, w_in, w_out), np.float32)
    for j in range(kw):
        for wo in range(w_out):
            wi = 2 * wo + j - 1
            if 0 <= wi < w_in:
                sel[j, wi, wo] = 1.0
    k = jnp.transpose(w_oihw, (2, 3, 1, 0))                    # (i, j, cin, cout)
    wr = jnp.einsum("jws,ijab->iwasb", jnp.asarray(sel), k)    # (i, w, cin, w2, cout)
    return wr.reshape(kh, w_in * cin, w_out * cout)


def _pool_matrix(w_out, c):
    """(w_out*c, w_out*c) projector: mean over the w groups of the lane dim,
    broadcast back to every lane of the same channel."""
    p = np.kron(np.ones((w_out, w_out), np.float32),
                np.eye(c, dtype=np.float32)) / np.float32(w_out)
    return jnp.asarray(p)


def _bn_lanes(gamma, beta, w_out):
    """(1, C) gamma/beta -> (2, w_out*C) lane-expanded [gamma; beta]."""
    return jnp.concatenate([jnp.tile(gamma, (1, w_out)),
                            jnp.tile(beta, (1, w_out))], axis=0)


def _head_weights(wmu, wlv, c2, h3, w3):
    """Merge the mu/logvar heads and absorb the NCHW flatten into the weights.

    wmu/wlv are stored (feat, L) with feat = c*h3*w3 + h*w3 + w (PyTorch
    nn.Flatten order).  Returns (h3*w3*c2, 2L) with rows ordered (h, w, c),
    matching the kernel's lane-concatenated conv3 output."""
    wcat = jnp.concatenate([wmu, wlv], axis=1)                 # (feat, 2L)
    l2 = wcat.shape[1]
    w4 = wcat.reshape(c2, h3, w3, l2)                          # [c, h, w, l]
    w4 = jnp.transpose(w4, (1, 2, 0, 3))                       # [h, w, c, l]
    return w4.reshape(h3 * w3 * c2, l2)


# ----------------------------------------------------------------------------
# Parameters & forward
# ----------------------------------------------------------------------------
def make_params(key):
    k = Config.kernel_size
    c0, c1, c2 = Config.encoder_channels
    cin = Config.in_channels
    feat = c2 * 4 * 4
    keys = jax.random.split(key, 13)

    def rnd(kk, shape, scale=0.05):
        return (scale * jax.random.normal(kk, shape)).astype(jnp.float32)

    return {
        # Conv weights in PyTorch OIHW layout.  conv3's bias is omitted: a conv
        # bias feeding training-mode BatchNorm is cancelled by the mean
        # subtraction and has no effect on the forward output.
        "w1": rnd(keys[0], (c0, cin, k, k)),
        "w2": rnd(keys[1], (c1, c0, k, k)),
        "w3": rnd(keys[2], (c2, c1, k, k)),
        "g1": 1.0 + rnd(keys[3], (1, c0)), "be1": rnd(keys[4], (1, c0)),
        "g2": 1.0 + rnd(keys[5], (1, c1)), "be2": rnd(keys[6], (1, c1)),
        "g3": 1.0 + rnd(keys[7], (1, c2)), "be3": rnd(keys[8], (1, c2)),
        # Linear weights stored transposed (in_features, out_features), rows in
        # PyTorch nn.Flatten (C, H, W) order.
        "wmu": rnd(keys[9], (feat, Config.latent_dim)),
        "bmu": rnd(keys[10], (1, Config.latent_dim)),
        "wlv": rnd(keys[11], (feat, Config.latent_dim)),
        "blv": rnd(keys[12], (1, Config.latent_dim)),
    }


def encoder_forward(x_nchw, params):
    """x_nchw: (N, Cin, H, W) float32 -> (mu, logvar), each (N, latent_dim)."""
    n, cin, h, w = x_nchw.shape
    c0, c1, c2 = Config.encoder_channels
    latent = Config.latent_dim
    h1, w1 = h // 2, w // 2
    h2, w2 = h1 // 2, w1 // 2
    h3, w3 = h2 // 2, w2 // 2

    # (N, C, H, W) -> (H, N, W*C) packed layout; MXU operand cast to bf16 so
    # the input DMA is also halved.  (See file-level TODO for folding this
    # transpose into a batch-gridded pipeline at large N.)
    xc = jnp.transpose(x_nchw, (2, 0, 3, 1)).reshape(h, n, w * cin)
    xc = xc.astype(MXU_DTYPE)

    # Trace-time constant expansions (batch-independent, weight-sized, bf16).
    def taps(w_oihw, w_in):
        wr = _row_tap_weights(w_oihw, w_in)
        return (jnp.concatenate([wr[1], wr[2]], axis=0).astype(MXU_DTYPE),
                wr[0].astype(MXU_DTYPE))

    weo1, wup1 = taps(params["w1"], w)          # (192, 128), ( 96, 128)
    weo2, wup2 = taps(params["w2"], w1)         # (256, 128), (128, 128)
    weo3, wup3 = taps(params["w3"], w2)         # (256, 128), (128, 128)
    # BN pooling projectors / affine params stay f32 (statistics precision).
    p1, p2, p3 = _pool_matrix(w1, c0), _pool_matrix(w2, c1), _pool_matrix(w3, c2)
    gb1 = _bn_lanes(params["g1"], params["be1"], w1)
    gb2 = _bn_lanes(params["g2"], params["be2"], w2)
    gb3 = _bn_lanes(params["g3"], params["be3"], w3)
    wh = _head_weights(params["wmu"], params["wlv"], c2, h3, w3).astype(MXU_DTYPE)
    bh = jnp.concatenate([params["bmu"], params["blv"]], axis=1)

    out = pl.pallas_call(
        encoder_kernel,
        out_shape=jax.ShapeDtypeStruct((n, 2 * latent), jnp.float32),
        in_specs=[_VMEM] * 15,
        out_specs=_VMEM,
        # Explicit scoped-VMEM budget: the working set here is < 2 MiB, but the
        # v5e default scoped limit is only 16 MiB, so be explicit and keep a
        # value that is safe on every generation (v7x physical VMEM = 64 MiB).
        compiler_params=pltpu.CompilerParams(vmem_limit_bytes=32 * 1024 * 1024),
    )(xc, weo1, wup1, weo2, wup2, weo3, wup3,
      p1, p2, p3, gb1, gb2, gb3, wh, bh)

    return out[:, :latent], out[:, latent:]


# ----------------------------------------------------------------------------
if __name__ == "__main__":
    key = jax.random.PRNGKey(0)
    kx, kp = jax.random.split(key)

    N = 2
    x = jax.random.normal(
        kx, (N, Config.in_channels, Config.image_size, Config.image_size),
        dtype=jnp.float32)
    params = make_params(kp)

    mu, logvar = jax.jit(encoder_forward)(x, params)
    jax.block_until_ready((mu, logvar))

    assert mu.shape == (N, Config.latent_dim) and logvar.shape == (N, Config.latent_dim)
    assert mu.dtype == jnp.float32 and logvar.dtype == jnp.float32
    print("KERNEL_OK")
</pallas_src>

<mosaic_0001>
module attributes {stable_mosaic.version = 11 : i64} {
  func.func @encoder_kernel(%arg0: memref<32x2x96xbf16, #tpu.memory_space<vmem>>, %arg1: memref<192x128xbf16, #tpu.memory_space<vmem>>, %arg2: memref<96x128xbf16, #tpu.memory_space<vmem>>, %arg3: memref<256x128xbf16, #tpu.memory_space<vmem>>, %arg4: memref<128x128xbf16, #tpu.memory_space<vmem>>, %arg5: memref<256x128xbf16, #tpu.memory_space<vmem>>, %arg6: memref<128x128xbf16, #tpu.memory_space<vmem>>, %arg7: memref<128x128xf32, #tpu.memory_space<vmem>>, %arg8: memref<128x128xf32, #tpu.memory_space<vmem>>, %arg9: memref<128x128xf32, #tpu.memory_space<vmem>>, %arg10: memref<2x128xf32, #tpu.memory_space<vmem>>, %arg11: memref<2x128xf32, #tpu.memory_space<vmem>>, %arg12: memref<2x128xf32, #tpu.memory_space<vmem>>, %arg13: memref<512x32xbf16, #tpu.memory_space<vmem>>, %arg14: memref<1x32xf32, #tpu.memory_space<vmem>>, %arg15: memref<2x32xf32, #tpu.memory_space<vmem>>) attributes {dimension_semantics = [], scalar_prefetch = 0 : i64, scratch_operands = 0 : i64, tpu.core_type = #tpu.core_type<tc>} {
    %c0 = arith.constant 0 : index
    %c0_0 = arith.constant 0 : index
    %c0_1 = arith.constant 0 : index
    %0 = vector.load %arg0[%c0, %c0_0, %c0_1] : memref<32x2x96xbf16, #tpu.memory_space<vmem>>, vector<32x2x96xbf16>
    %c0_2 = arith.constant 0 : index
    %c0_3 = arith.constant 0 : index
    %1 = vector.load %arg1[%c0_2, %c0_3] : memref<192x128xbf16, #tpu.memory_space<vmem>>, vector<192x128xbf16>
    %c0_4 = arith.constant 0 : index
    %c0_5 = arith.constant 0 : index
    %2 = vector.load %arg2[%c0_4, %c0_5] : memref<96x128xbf16, #tpu.memory_space<vmem>>, vector<96x128xbf16>
    %c0_6 = arith.constant 0 : index
    %c0_7 = arith.constant 0 : index
    %3 = vector.load %arg7[%c0_6, %c0_7] : memref<128x128xf32, #tpu.memory_space<vmem>>, vector<128x128xf32>
    %c0_8 = arith.constant 0 : index
    %c0_9 = arith.constant 0 : index
    %4 = vector.load %arg10[%c0_8, %c0_9] : memref<2x128xf32, #tpu.memory_space<vmem>>, vector<2x128xf32>
    %5 = vector.shape_cast %0 : vector<32x2x96xbf16> to vector<16x2x2x96xbf16>
    %6 = vector.extract_strided_slice %5 {offsets = [0, 0, 0, 0], sizes = [16, 1, 2, 96], strides = [1, 1, 1, 1]} : vector<16x2x2x96xbf16> to vector<16x1x2x96xbf16>
    %7 = vector.shape_cast %6 : vector<16x1x2x96xbf16> to vector<16x2x96xbf16>
    %8 = vector.extract_strided_slice %5 {offsets = [0, 1, 0, 0], sizes = [16, 1, 2, 96], strides = [1, 1, 1, 1]} : vector<16x2x2x96xbf16> to vector<16x1x2x96xbf16>
    %9 = vector.shape_cast %8 : vector<16x1x2x96xbf16> to vector<16x2x96xbf16>
    %10 = tpu.concatenate %7, %9 in 2 : vector<16x2x96xbf16>, vector<16x2x96xbf16> -> vector<16x2x192xbf16>
    %11 = vector.shape_cast %10 : vector<16x2x192xbf16> to vector<32x192xbf16>
    %cst = arith.constant dense<0.000000e+00> : vector<32x128xf32>
    %12 = tpu.matmul %11, %1, %cst {dimension_numbers = #tpu.dot_dimension_numbers<[1], [0], [0], [1], [0, 0, 1, 1], [], []>} : vector<32x192xbf16>, vector<192x128xbf16>, vector<32x128xf32> -> vector<32x128xf32>
    %13 = vector.shape_cast %9 : vector<16x2x96xbf16> to vector<32x96xbf16>
    %cst_10 = arith.constant dense<0.000000e+00> : vector<32x128xf32>
    %14 = tpu.matmul %13, %2, %cst_10 {dimension_numbers = #tpu.dot_dimension_numbers<[1], [0], [0], [1], [0, 0, 1, 1], [], []>} : vector<32x96xbf16>, vector<96x128xbf16>, vector<32x128xf32> -> vector<32x128xf32>
    %15 = vector.shape_cast %14 : vector<32x128xf32> to vector<16x2x128xf32>
    %cst_11 = arith.constant 0.000000e+00 : f32
    %16 = vector.broadcast %cst_11 : f32 to vector<1x2x128xf32>
    %17 = vector.extract_strided_slice %15 {offsets = [0, 0, 0], sizes = [15, 2, 128], strides = [1, 1, 1]} : vector<16x2x128xf32> to vector<15x2x128xf32>
    %18 = tpu.concatenate %16, %17 in 0 : vector<1x2x128xf32>, vector<15x2x128xf32> -> vector<16x2x128xf32>
    %19 = vector.shape_cast %18 : vector<16x2x128xf32> to vector<32x128xf32>
    %20 = arith.addf %12, %19 : vector<32x128xf32>
    %cst_12 = arith.constant dense<0.000000e+00> : vector<128xf32>
    %21 = vector.multi_reduction <add>, %20, %cst_12 [0] : vector<32x128xf32> to vector<128xf32>
    %22 = vector.shape_cast %21 : vector<128xf32> to vector<1x128xf32>
    %23 = arith.mulf %20, %20 : vector<32x128xf32>
    %cst_13 = arith.constant dense<0.000000e+00> : vector<128xf32>
    %24 = vector.multi_reduction <add>, %23, %cst_13 [0] : vector<32x128xf32> to vector<128xf32>
    %25 = vector.shape_cast %24 : vector<128xf32> to vector<1x128xf32>
    %26 = tpu.concatenate %22, %25 in 0 : vector<1x128xf32>, vector<1x128xf32> -> vector<2x128xf32>
    %cst_14 = arith.constant 3.125000e-02 : f32
    %27 = vector.broadcast %cst_14 : f32 to vector<2x128xf32>
    %28 = arith.mulf %26, %27 : vector<2x128xf32>
    %cst_15 = arith.constant dense<0.000000e+00> : vector<2x128xf32>
    %29 = tpu.matmul %28, %3, %cst_15 {dimension_numbers = #tpu.dot_dimension_numbers<[1], [0], [0], [1], [0, 0, 1, 1], [], []>} : vector<2x128xf32>, vector<128x128xf32>, vector<2x128xf32> -> vector<2x128xf32>
    %30 = vector.extract_strided_slice %29 {offsets = [0, 0], sizes = [1, 128], strides = [1, 1]} : vector<2x128xf32> to vector<1x128xf32>
    %31 = vector.extract_strided_slice %29 {offsets = [1, 0], sizes = [1, 128], strides = [1, 1]} : vector<2x128xf32> to vector<1x128xf32>
    %32 = arith.mulf %30, %30 : vector<1x128xf32>
    %33 = arith.subf %31, %32 : vector<1x128xf32>
    %34 = vector.extract_strided_slice %4 {offsets = [0, 0], sizes = [1, 128], strides = [1, 1]} : vector<2x128xf32> to vector<1x128xf32>
    %cst_16 = arith.constant 9.99999974E-6 : f32
    %35 = vector.broadcast %cst_16 : f32 to vector<1x128xf32>
    %36 = arith.addf %33, %35 : vector<1x128xf32>
    %37 = math.rsqrt %36 : vector<1x128xf32>
    %38 = arith.mulf %34, %37 : vector<1x128xf32>
    %39 = vector.extract_strided_slice %4 {offsets = [1, 0], sizes = [1, 128], strides = [1, 1]} : vector<2x128xf32> to vector<1x128xf32>
    %40 = arith.mulf %30, %38 : vector<1x128xf32>
    %41 = arith.subf %39, %40 : vector<1x128xf32>
    %42 = vector.broadcast %38 : vector<1x128xf32> to vector<32x128xf32>
    %43 = arith.mulf %20, %42 : vector<32x128xf32>
    %44 = vector.broadcast %41 : vector<1x128xf32> to vector<32x128xf32>
    %45 = arith.addf %43, %44 : vector<32x128xf32>
    %cst_17 = arith.constant 0.000000e+00 : f32
    %46 = vector.broadcast %cst_17 : f32 to vector<32x128xf32>
    %47 = arith.maximumf %45, %46 : vector<32x128xf32>
    %48 = vector.shape_cast %47 : vector<32x128xf32> to vector<16x2x128xf32>
    %c0_18 = arith.constant 0 : index
    %c0_19 = arith.constant 0 : index
    %49 = vector.load %arg3[%c0_18, %c0_19] : memref<256x128xbf16, #tpu.memory_space<vmem>>, vector<256x128xbf16>
    %c0_20 = arith.constant 0 : index
    %c0_21 = arith.constant 0 : index
    %50 = vector.load %arg4[%c0_20, %c0_21] : memref<128x128xbf16, #tpu.memory_space<vmem>>, vector<128x128xbf16>
    %c0_22 = arith.constant 0 : index
    %c0_23 = arith.constant 0 : index
    %51 = vector.load %arg8[%c0_22, %c0_23] : memref<128x128xf32, #tpu.memory_space<vmem>>, vector<128x128xf32>
    %c0_24 = arith.constant 0 : index
    %c0_25 = arith.constant 0 : index
    %52 = vector.load %arg11[%c0_24, %c0_25] : memref<2x128xf32, #tpu.memory_space<vmem>>, vector<2x128xf32>
    %53 = vector.shape_cast %48 : vector<16x2x128xf32> to vector<8x2x2x128xf32>
    %54 = vector.extract_strided_slice %53 {offsets = [0, 0, 0, 0], sizes = [8, 1, 2, 128], strides = [1, 1, 1, 1]} : vector<8x2x2x128xf32> to vector<8x1x2x128xf32>
    %55 = vector.shape_cast %54 : vector<8x1x2x128xf32> to vector<8x2x128xf32>
    %56 = vector.extract_strided_slice %53 {offsets = [0, 1, 0, 0], sizes = [8, 1, 2, 128], strides = [1, 1, 1, 1]} : vector<8x2x2x128xf32> to vector<8x1x2x128xf32>
    %57 = vector.shape_cast %56 : vector<8x1x2x128xf32> to vector<8x2x128xf32>
    %58 = tpu.concatenate %55, %57 in 2 : vector<8x2x128xf32>, vector<8x2x128xf32> -> vector<8x2x256xf32>
    %59 = vector.shape_cast %58 : vector<8x2x256xf32> to vector<16x256xf32>
    %60 = arith.truncf %59 : vector<16x256xf32> to vector<16x256xbf16>
    %cst_26 = arith.constant dense<0.000000e+00> : vector<16x128xf32>
    %61 = tpu.matmul %60, %49, %cst_26 {dimension_numbers = #tpu.dot_dimension_numbers<[1], [0], [0], [1], [0, 0, 1, 1], [], []>} : vector<16x256xbf16>, vector<256x128xbf16>, vector<16x128xf32> -> vector<16x128xf32>
    %62 = vector.shape_cast %57 : vector<8x2x128xf32> to vector<16x128xf32>
    %63 = arith.truncf %62 : vector<16x128xf32> to vector<16x128xbf16>
    %cst_27 = arith.constant dense<0.000000e+00> : vector<16x128xf32>
    %64 = tpu.matmul %63, %50, %cst_27 {dimension_numbers = #tpu.dot_dimension_numbers<[1], [0], [0], [1], [0, 0, 1, 1], [], []>} : vector<16x128xbf16>, vector<128x128xbf16>, vector<16x128xf32> -> vector<16x128xf32>
    %65 = vector.shape_cast %64 : vector<16x128xf32> to vector<8x2x128xf32>
    %cst_28 = arith.constant 0.000000e+00 : f32
    %66 = vector.broadcast %cst_28 : f32 to vector<1x2x128xf32>
    %67 = vector.extract_strided_slice %65 {offsets = [0, 0, 0], sizes = [7, 2, 128], strides = [1, 1, 1]} : vector<8x2x128xf32> to vector<7x2x128xf32>
    %68 = tpu.concatenate %66, %67 in 0 : vector<1x2x128xf32>, vector<7x2x128xf32> -> vector<8x2x128xf32>
    %69 = vector.shape_cast %68 : vector<8x2x128xf32> to vector<16x128xf32>
    %70 = arith.addf %61, %69 : vector<16x128xf32>
    %cst_29 = arith.constant dense<0.000000e+00> : vector<128xf32>
    %71 = vector.multi_reduction <add>, %70, %cst_29 [0] : vector<16x128xf32> to vector<128xf32>
    %72 = vector.shape_cast %71 : vector<128xf32> to vector<1x128xf32>
    %73 = arith.mulf %70, %70 : vector<16x128xf32>
    %cst_30 = arith.constant dense<0.000000e+00> : vector<128xf32>
    %74 = vector.multi_reduction <add>, %73, %cst_30 [0] : vector<16x128xf32> to vector<128xf32>
    %75 = vector.shape_cast %74 : vector<128xf32> to vector<1x128xf32>
    %76 = tpu.concatenate %72, %75 in 0 : vector<1x128xf32>, vector<1x128xf32> -> vector<2x128xf32>
    %cst_31 = arith.constant 6.250000e-02 : f32
    %77 = vector.broadcast %cst_31 : f32 to vector<2x128xf32>
    %78 = arith.mulf %76, %77 : vector<2x128xf32>
    %cst_32 = arith.constant dense<0.000000e+00> : vector<2x128xf32>
    %79 = tpu.matmul %78, %51, %cst_32 {dimension_numbers = #tpu.dot_dimension_numbers<[1], [0], [0], [1], [0, 0, 1, 1], [], []>} : vector<2x128xf32>, vector<128x128xf32>, vector<2x128xf32> -> vector<2x128xf32>
    %80 = vector.extract_strided_slice %79 {offsets = [0, 0], sizes = [1, 128], strides = [1, 1]} : vector<2x128xf32> to vector<1x128xf32>
    %81 = vector.extract_strided_slice %79 {offsets = [1, 0], sizes = [1, 128], strides = [1, 1]} : vector<2x128xf32> to vector<1x128xf32>
    %82 = arith.mulf %80, %80 : vector<1x128xf32>
    %83 = arith.subf %81, %82 : vector<1x128xf32>
    %84 = vector.extract_strided_slice %52 {offsets = [0, 0], sizes = [1, 128], strides = [1, 1]} : vector<2x128xf32> to vector<1x128xf32>
    %cst_33 = arith.constant 9.99999974E-6 : f32
    %85 = vector.broadcast %cst_33 : f32 to vector<1x128xf32>
    %86 = arith.addf %83, %85 : vector<1x128xf32>
    %87 = math.rsqrt %86 : vector<1x128xf32>
    %88 = arith.mulf %84, %87 : vector<1x128xf32>
    %89 = vector.extract_strided_slice %52 {offsets = [1, 0], sizes = [1, 128], strides = [1, 1]} : vector<2x128xf32> to vector<1x128xf32>
    %90 = arith.mulf %80, %88 : vector<1x128xf32>
    %91 = arith.subf %89, %90 : vector<1x128xf32>
    %92 = vector.broadcast %88 : vector<1x128xf32> to vector<16x128xf32>
    %93 = arith.mulf %70, %92 : vector<16x128xf32>
    %94 = vector.broadcast %91 : vector<1x128xf32> to vector<16x128xf32>
    %95 = arith.addf %93, %94 : vector<16x128xf32>
    %cst_34 = arith.constant 0.000000e+00 : f32
    %96 = vector.broadcast %cst_34 : f32 to vector<16x128xf32>
    %97 = arith.maximumf %95, %96 : vector<16x128xf32>
    %98 = vector.shape_cast %97 : vector<16x128xf32> to vector<8x2x128xf32>
    %c0_35 = arith.constant 0 : index
    %c0_36 = arith.constant 0 : index
    %99 = vector.load %arg5[%c0_35, %c0_36] : memref<256x128xbf16, #tpu.memory_space<vmem>>, vector<256x128xbf16>
    %c0_37 = arith.constant 0 : index
    %c0_38 = arith.constant 0 : index
    %100 = vector.load %arg6[%c0_37, %c0_38] : memref<128x128xbf16, #tpu.memory_space<vmem>>, vector<128x128xbf16>
    %c0_39 = arith.constant 0 : index
    %c0_40 = arith.constant 0 : index
    %101 = vector.load %arg9[%c0_39, %c0_40] : memref<128x128xf32, #tpu.memory_space<vmem>>, vector<128x128xf32>
    %c0_41 = arith.constant 0 : index
    %c0_42 = arith.constant 0 : index
    %102 = vector.load %arg12[%c0_41, %c0_42] : memref<2x128xf32, #tpu.memory_space<vmem>>, vector<2x128xf32>
    %103 = vector.shape_cast %98 : vector<8x2x128xf32> to vector<4x2x2x128xf32>
    %104 = vector.extract_strided_slice %103 {offsets = [0, 0, 0, 0], sizes = [4, 1, 2, 128], strides = [1, 1, 1, 1]} : vector<4x2x2x128xf32> to vector<4x1x2x128xf32>
    %105 = vector.shape_cast %104 : vector<4x1x2x128xf32> to vector<4x2x128xf32>
    %106 = vector.extract_strided_slice %103 {offsets = [0, 1, 0, 0], sizes = [4, 1, 2, 128], strides = [1, 1, 1, 1]} : vector<4x2x2x128xf32> to vector<4x1x2x128xf32>
    %107 = vector.shape_cast %106 : vector<4x1x2x128xf32> to vector<4x2x128xf32>
    %108 = tpu.concatenate %105, %107 in 2 : vector<4x2x128xf32>, vector<4x2x128xf32> -> vector<4x2x256xf32>
    %109 = vector.shape_cast %108 : vector<4x2x256xf32> to vector<8x256xf32>
    %110 = arith.truncf %109 : vector<8x256xf32> to vector<8x256xbf16>
    %cst_43 = arith.constant dense<0.000000e+00> : vector<8x128xf32>
    %111 = tpu.matmul %110, %99, %cst_43 {dimension_numbers = #tpu.dot_dimension_numbers<[1], [0], [0], [1], [0, 0, 1, 1], [], []>} : vector<8x256xbf16>, vector<256x128xbf16>, vector<8x128xf32> -> vector<8x128xf32>
    %112 = vector.shape_cast %107 : vector<4x2x128xf32> to vector<8x128xf32>
    %113 = arith.truncf %112 : vector<8x128xf32> to vector<8x128xbf16>
    %cst_44 = arith.constant dense<0.000000e+00> : vector<8x128xf32>
    %114 = tpu.matmul %113, %100, %cst_44 {dimension_numbers = #tpu.dot_dimension_numbers<[1], [0], [0], [1], [0, 0, 1, 1], [], []>} : vector<8x128xbf16>, vector<128x128xbf16>, vector<8x128xf32> -> vector<8x128xf32>
    %115 = vector.shape_cast %114 : vector<8x128xf32> to vector<4x2x128xf32>
    %cst_45 = arith.constant 0.000000e+00 : f32
    %116 = vector.broadcast %cst_45 : f32 to vector<1x2x128xf32>
    %117 = vector.extract_strided_slice %115 {offsets = [0, 0, 0], sizes = [3, 2, 128], strides = [1, 1, 1]} : vector<4x2x128xf32> to vector<3x2x128xf32>
    %118 = tpu.concatenate %116, %117 in 0 : vector<1x2x128xf32>, vector<3x2x128xf32> -> vector<4x2x128xf32>
    %119 = vector.shape_cast %118 : vector<4x2x128xf32> to vector<8x128xf32>
    %120 = arith.addf %111, %119 : vector<8x128xf32>
    %cst_46 = arith.constant dense<0.000000e+00> : vector<128xf32>
    %121 = vector.multi_reduction <add>, %120, %cst_46 [0] : vector<8x128xf32> to vector<128xf32>
    %122 = vector.shape_cast %121 : vector<128xf32> to vector<1x128xf32>
    %123 = arith.mulf %120, %120 : vector<8x128xf32>
    %cst_47 = arith.constant dense<0.000000e+00> : vector<128xf32>
    %124 = vector.multi_reduction <add>, %123, %cst_47 [0] : vector<8x128xf32> to vector<128xf32>
    %125 = vector.shape_cast %124 : vector<128xf32> to vector<1x128xf32>
    %126 = tpu.concatenate %122, %125 in 0 : vector<1x128xf32>, vector<1x128xf32> -> vector<2x128xf32>
    %cst_48 = arith.constant 1.250000e-01 : f32
    %127 = vector.broadcast %cst_48 : f32 to vector<2x128xf32>
    %128 = arith.mulf %126, %127 : vector<2x128xf32>
    %cst_49 = arith.constant dense<0.000000e+00> : vector<2x128xf32>
    %129 = tpu.matmul %128, %101, %cst_49 {dimension_numbers = #tpu.dot_dimension_numbers<[1], [0], [0], [1], [0, 0, 1, 1], [], []>} : vector<2x128xf32>, vector<128x128xf32>, vector<2x128xf32> -> vector<2x128xf32>
    %130 = vector.extract_strided_slice %129 {offsets = [0, 0], sizes = [1, 128], strides = [1, 1]} : vector<2x128xf32> to vector<1x128xf32>
    %131 = vector.extract_strided_slice %129 {offsets = [1, 0], sizes = [1, 128], strides = [1, 1]} : vector<2x128xf32> to vector<1x128xf32>
    %132 = arith.mulf %130, %130 : vector<1x128xf32>
    %133 = arith.subf %131, %132 : vector<1x128xf32>
    %134 = vector.extract_strided_slice %102 {offsets = [0, 0], sizes = [1, 128], strides = [1, 1]} : vector<2x128xf32> to vector<1x128xf32>
    %cst_50 = arith.constant 9.99999974E-6 : f32
    %135 = vector.broadcast %cst_50 : f32 to vector<1x128xf32>
    %136 = arith.addf %133, %135 : vector<1x128xf32>
    %137 = math.rsqrt %136 : vector<1x128xf32>
    %138 = arith.mulf %134, %137 : vector<1x128xf32>
    %139 = vector.extract_strided_slice %102 {offsets = [1, 0], sizes = [1, 128], strides = [1, 1]} : vector<2x128xf32> to vector<1x128xf32>
    %140 = arith.mulf %130, %138 : vector<1x128xf32>
    %141 = arith.subf %139, %140 : vector<1x128xf32>
    %142 = vector.broadcast %138 : vector<1x128xf32> to vector<8x128xf32>
    %143 = arith.mulf %120, %142 : vector<8x128xf32>
    %144 = vector.broadcast %141 : vector<1x128xf32> to vector<8x128xf32>
    %145 = arith.addf %143, %144 : vector<8x128xf32>
    %cst_51 = arith.constant 0.000000e+00 : f32
    %146 = vector.broadcast %cst_51 : f32 to vector<8x128xf32>
    %147 = arith.maximumf %145, %146 : vector<8x128xf32>
    %148 = vector.shape_cast %147 : vector<8x128xf32> to vector<4x2x128xf32>
    %149 = vector.extract_strided_slice %148 {offsets = [0, 0, 0], sizes = [1, 2, 128], strides = [1, 1, 1]} : vector<4x2x128xf32> to vector<1x2x128xf32>
    %150 = vector.shape_cast %149 : vector<1x2x128xf32> to vector<2x128xf32>
    %151 = vector.extract_strided_slice %148 {offsets = [1, 0, 0], sizes = [1, 2, 128], strides = [1, 1, 1]} : vector<4x2x128xf32> to vector<1x2x128xf32>
    %152 = vector.shape_cast %151 : vector<1x2x128xf32> to vector<2x128xf32>
    %153 = vector.extract_strided_slice %148 {offsets = [2, 0, 0], sizes = [1, 2, 128], strides = [1, 1, 1]} : vector<4x2x128xf32> to vector<1x2x128xf32>
    %154 = vector.shape_cast %153 : vector<1x2x128xf32> to vector<2x128xf32>
    %155 = vector.extract_strided_slice %148 {offsets = [3, 0, 0], sizes = [1, 2, 128], strides = [1, 1, 1]} : vector<4x2x128xf32> to vector<1x2x128xf32>
    %156 = vector.shape_cast %155 : vector<1x2x128xf32> to vector<2x128xf32>
    %157 = tpu.concatenate %150, %152, %154, %156 in 1 : vector<2x128xf32>, vector<2x128xf32>, vector<2x128xf32>, vector<2x128xf32> -> vector<2x512xf32>
    %158 = arith.truncf %157 : vector<2x512xf32> to vector<2x512xbf16>
    %c0_52 = arith.constant 0 : index
    %c0_53 = arith.constant 0 : index
    %159 = vector.load %arg13[%c0_52, %c0_53] : memref<512x32xbf16, #tpu.memory_space<vmem>>, vector<512x32xbf16>
    %cst_54 = arith.constant dense<0.000000e+00> : vector<2x32xf32>
    %160 = tpu.matmul %158, %159, %cst_54 {dimension_numbers = #tpu.dot_dimension_numbers<[1], [0], [0], [1], [0, 0, 1, 1], [], []>} : vector<2x512xbf16>, vector<512x32xbf16>, vector<2x32xf32> -> vector<2x32xf32>
    %c0_55 = arith.constant 0 : index
    %c0_56 = arith.constant 0 : index
    %161 = vector.load %arg14[%c0_55, %c0_56] : memref<1x32xf32, #tpu.memory_space<vmem>>, vector<1x32xf32>
    %162 = vector.broadcast %161 : vector<1x32xf32> to vector<2x32xf32>
    %163 = arith.addf %160, %162 : vector<2x32xf32>
    %c0_57 = arith.constant 0 : index
    %c0_58 = arith.constant 0 : index
    %164 = vector.load %arg15[%c0_57, %c0_58] : memref<2x32xf32, #tpu.memory_space<vmem>>, vector<2x32xf32>
    tpu.vector_store %arg15[%c0_57, %c0_58], %163 {strides = array<i32>} : memref<2x32xf32, #tpu.memory_space<vmem>>, vector<2x32xf32>,
    return
  }
}

</mosaic_0001>

<bundles_post_ra>
// kernel: encoder_forward.1
= control target key start
LH: loop header
LB: loop body
LE: loop exit
PB: predicated region body
PF: predicated region fallthrough
CT: control target
= control target key end

     0   :  { %v155_v0 = vlaneseq  ;;  %v3672_v1 = vmov 1966171168   ;;  %v3673_v3 = vmov 0   ;;  %s3674_s25 = smov 96   ;;  %vm408_vm0 = vcmask 785408   ;;  %s4642_s0 = inlined_call_operand.vmem [shape: bf16[32,2,96], index: 0, kind: input, shape index: {}]   ;;  %s4643_s1 = inlined_call_operand.vmem [shape: bf16[192,128], index: 1, kind: input, shape index: {}]   ;;  %s4644_s2 = inlined_call_operand.vmem [shape: bf16[96,128], index: 2, kind: input, shape index: {}]   ;;  %s4645_s7 = inlined_call_operand.vmem [shape: f32[128,128], index: 7, kind: input, shape index: {}]   ;;  %s4646_s4 = inlined_call_operand.vmem [shape: bf16[128,128], index: 4, kind: input, shape index: {}]   ;;  %s4647_s3 = inlined_call_operand.vmem [shape: bf16[256,128], index: 3, kind: input, shape index: {}]   ;;  %s4648_s10 = inlined_call_operand.vmem [shape: f32[2,128], index: 10, kind: input, shape index: {}]   ;;  %s4649_s8 = inlined_call_operand.vmem [shape: f32[128,128], index: 8, kind: input, shape index: {}]   ;;  %s4650_s6 = inlined_call_operand.vmem [shape: bf16[128,128], index: 6, kind: input, shape index: {}]   ;;  %s4651_s5 = inlined_call_operand.vmem [shape: bf16[256,128], index: 5, kind: input, shape index: {}]   ;;  %s4652_s11 = inlined_call_operand.vmem [shape: f32[2,128], index: 11, kind: input, shape index: {}]   ;;  %s4653_s9 = inlined_call_operand.vmem [shape: f32[128,128], index: 9, kind: input, shape index: {}]   ;;  %s4654_s13 = inlined_call_operand.vmem [shape: bf16[512,32], index: 13, kind: input, shape index: {}]   ;;  %s4655_s12 = inlined_call_operand.vmem [shape: f32[2,128], index: 12, kind: input, shape index: {}]   ;;  %s4656_s14 = inlined_call_operand.vmem [shape: f32[1,32], index: 14, kind: input, shape index: {}]   ;;  %s4657_s15 = inlined_call_operand.vmem [shape: f32[2,32], index: 15, kind: output, shape index: {}]  }
   0x1   :  { %v153_v2 = vunpack.c.l.s4 %v3672_v1  ;;  %1259 = vmatprep.subr.bf16.mxu1 %v3673_v3  ;;  %v3568_v5 = vld [vmem:[%s4643_s1] sm:$0xff]   ;;  %v62_v12 = vld [vmem:[%s4642_s0 + $0xb] sm:$0x1]  ;;  %v60_v13 = vld [vmem:[%s4642_s0 + $0x9] sm:$0x1]  ;;  %vm1252_vm1 = vcmask 523264  }
   0x2   :  { %v3760_v4 = vshrl.u32 %v155_v0, 7  ;;  %v56_v6 = vld [vmem:[%s4642_s0 + $0x5] sm:$0x1]  ;;  %v58_v8 = vld [vmem:[%s4642_s0 + $0x7] sm:$0x1]  ;;  %1260 = vmatpush1.bf16.msra.mxu1 %v3568_v5  ;;  %v3569_v18 = vld [vmem:[%s4643_s1 + $0x8] sm:$0xff]   ;;  %v715_v31 = vcombine.low %v60_v13, %v62_v12 }
   0x3   :  { %v154_v7 = vunpack.c.0.s8 %v153_v2  ;;  %v52_v9 = vld [vmem:[%s4642_s0 + $0x1] sm:$0x1]  ;;  %v54_v10 = vld [vmem:[%s4642_s0 + $0x3] sm:$0x1]  ;;  %1261 = vmatprep.subr.bf16.mxu1 %v3673_v3  ;;  %v66_v21 = vld [vmem:[%s4642_s0 + $0xf] sm:$0x1]  ;;  %v714_v29 = vcombine.low %v56_v6, %v58_v8 }
   0x4   :  { %v3570_v22 = vld [vmem:[%s4643_s1 + $0x10] sm:$0xff]   ;;  %v3571_v24 = vld [vmem:[%s4644_s2] sm:$0xff]   ;;  %v64_v28 = vld [vmem:[%s4642_s0 + $0xd] sm:$0x1]  ;;  %v713_v30 = vcombine.low %v52_v9, %v54_v10  ;;  %vm3678_vm2 = vmmov 0   ;;  %vm1330_vm3 = vcmask 1040384  }
   0x5   :  { %v3778_v11 = vsub.s32 %v154_v7, %v3760_v4  ;;  %v716_v32 = vcombine.low %v64_v28, %v66_v21  ;;  %3328 = vmatprep.subr.bf16.mxu0 %v3571_v24  ;;  %v3573_v33 = vld [vmem:[%s4644_s2 + $0x8] sm:$0xff]   ;;  %v70_v36 = vld [vmem:[%s4642_s0 + $0x13] sm:$0x1]  ;;  %v3572_v37 = vld [vmem:[%s4643_s1 + $0x18] sm:$0xff]   ;;  %vm3048_vm4 = vcmask 254976  }
   0x6   :  { %1262 = vmatpush1.bf16.msra.mxu1 %v3569_v18  ;;  %v68_v40 = vld [vmem:[%s4642_s0 + $0x11] sm:$0x1]  ;;  %v74_v41 = vld [vmem:[%s4642_s0 + $0x17] sm:$0x1]  ;;  %v72_v42 = vld [vmem:[%s4642_s0 + $0x15] sm:$0x1]  ;;  %3329 = vmatpush3.bf16.msra.mxu0 %v3571_v24 }
   0x7   :  { %v186_v14 = vrot.slane %v56_v6, %v3778_v11  ;;  %v158_v15 = vrot.slane %v52_v9, %v3778_v11  ;;  %v200_v16 = vrot.slane %v58_v8, %v3778_v11  ;;  %v172_v17 = vrot.slane %v54_v10, %v3778_v11  ;;  %1263 = vmatprep.subr.bf16.mxu1 %v3673_v3  ;;  %v78_v46 = vld [vmem:[%s4642_s0 + $0x1b] sm:$0x1]  ;;  %v3848_v47 = vld [vmem:[%s4642_s0 + $0x19] sm:$0x1]  ;;  %v3575_v48 = vld [vmem:[%s4644_s2 + $0x10] sm:$0xff]  }
   0x8   :  { %v228_v23 = vrot.slane %v62_v12, %v3778_v11  ;;  %v214_v27 = vrot.slane %v60_v13, %v3778_v11  ;;  %v256_v34 = vrot.slane %v66_v21, %v3778_v11  ;;  %v242_v35 = vrot.slane %v64_v28, %v3778_v11  ;;  %3330 = vmatprep.subr.bf16.mxu0 %v3573_v33  ;;  %v3574_v54 = vld [vmem:[%s4643_s1 + $0x20] sm:$0xff]   ;;  %v82_v58 = vld [vmem:[%s4642_s0 + $0x1f] sm:$0x1]  ;;  %v80_v59 = vld [vmem:[%s4642_s0 + $0x1d] sm:$0x1] }
   0x9   :  { %v193_v19 = vrot.slane %v186_v14, %v3778_v11  ;;  %v165_v20 = vrot.slane %v158_v15, %v3778_v11  ;;  %v207_v25 = vrot.slane %v200_v16, %v3778_v11  ;;  %v179_v26 = vrot.slane %v172_v17, %v3778_v11  ;;  %v3577_v0 = vld [vmem:[%s4644_s2 + $0x18] sm:$0xff]   ;;  %v3576_v7 = vld [vmem:[%s4643_s1 + $0x28] sm:$0xff]   ;;  %v3579_v15 = vld [vmem:[%s4644_s2 + $0x20] sm:$0xff]  }
   0xa   :  { %1264 = vmatpush1.bf16.msra.mxu1 %v3570_v22  ;;  %v235_v38 = vrot.slane %v228_v23, %v3778_v11  ;;  %v221_v39 = vrot.slane %v214_v27, %v3778_v11  ;;  %v723_v43 = vrot.slane %v713_v30, %v3778_v11  ;;  %v730_v44 = vrot.slane %v714_v29, %v3778_v11  ;;  %v3578_v17 = vld [vmem:[%s4643_s1 + $0x30] sm:$0xff]   ;;  %v3581_v23 = vld [vmem:[%s4644_s2 + $0x28] sm:$0xff]  }
   0xb   :  { %380 = vrot.lane.b32.xlu1 %v193_v19, %s3674_s25  ;;  %376 = vrot.lane.b32.xlu0 %v165_v20, %s3674_s25  ;;  %v762_v45 = vcombine.low %v68_v40, %v70_v36  ;;  %v737_v49 = vrot.slane %v715_v31, %v3778_v11  ;;  %v744_v50 = vrot.slane %v716_v32, %v3778_v11  ;;  %v3582_v31 = vld [vmem:[%s4643_s1 + $0x40] sm:$0xff]  }
   0xc   :  { %1265 = vmatprep.subr.bf16.mxu1 %v3673_v3  ;;  %v263_v51 = vrot.slane %v256_v34, %v3778_v11  ;;  %v249_v52 = vrot.slane %v242_v35, %v3778_v11  ;;  %v763_v53 = vcombine.low %v72_v42, %v74_v41  ;;  %v745_v55 = vcombine.low %v723_v43, %v730_v44  ;;  %v3583_v35 = vld [vmem:[%s4643_s1 + $0x48] sm:$0xff]   ;;  %v57_v44 = vld [vmem:[%s4642_s0 + $0x6] sm:$0x1] }
   0xd   :  { %v284_v56 = vrot.slane %v70_v36, %v3778_v11  ;;  %v270_v57 = vrot.slane %v68_v40, %v3778_v11  ;;  %v746_v60 = vcombine.low %v737_v49, %v744_v50  ;;  %v764_v61 = vcombine.low %v3848_v47, %v78_v46  ;;  %3331 = vmatpush3.bf16.msra.mxu0 %v3573_v33  ;;  %v3584_v36 = vld [vmem:[%s4643_s1 + $0x50] sm:$0xff]  }
   0xe   :  { %1266 = vmatpush1.bf16.msra.mxu1 %v3572_v37  ;;  %v765_v62 = vcombine.low %v80_v59, %v82_v58  ;;  %v753_v63 = vrot.slane %v745_v55, %v3778_v11  ;;  %3332 = vmatprep.subr.bf16.mxu0 %v3575_v48  ;;  %v772_v2 = vrot.slane %v762_v45, %v3778_v11  ;;  %v3585_v37 = vld [vmem:[%s4643_s1 + $0x58] sm:$0xff]   ;;  %v59_v55 = vld [vmem:[%s4642_s0 + $0x8] sm:$0x1] }
   0xf   :  { %382 = vrot.lane.b32.xlu1 %v207_v25, %s3674_s25  ;;  %378 = vrot.lane.b32.xlu0 %v179_v26, %s3674_s25  ;;  %v760_v1 = vrot.slane %v746_v60, %v3778_v11  ;;  %v312_v5 = vrot.slane %v74_v41, %v3778_v11  ;;  %v298_v6 = vrot.slane %v72_v42, %v3778_v11  ;;  %v3580_v25 = vld [vmem:[%s4643_s1 + $0x38] sm:$0xff]  }
  0x10   :  { %1267 = vmatprep.subr.bf16.mxu1 %v3673_v3  ;;  %v291_v8 = vrot.slane %v284_v56, %v3778_v11  ;;  %v277_v9 = vrot.slane %v270_v57, %v3778_v11  ;;  %v779_v12 = vrot.slane %v763_v53, %v3778_v11  ;;  %v786_v13 = vrot.slane %v764_v61, %v3778_v11 }
  0x11   :  { %v761_v10 = vcombine.low %v753_v63, %v760_v1  ;;  %v793_v14 = vrot.slane %v765_v62, %v3778_v11  ;;  %3333 = vmatpush3.bf16.msra.mxu0 %v3575_v48  ;;  %v340_v16 = vrot.slane %v78_v46, %v3778_v11  ;;  %v319_v18 = vrot.slane %v312_v5, %v3778_v11  ;;  %v63_v5 = vld [vmem:[%s4642_s0 + $0xc] sm:$0x1] }
  0x12   :  { %1268 = vmatpush1.bf16.msra.mxu1 %v3574_v54  ;;  %3334 = vmatprep.subr.bf16.mxu0 %v3577_v0  ;;  %v305_v19 = vrot.slane %v298_v6, %v3778_v11  ;;  %v326_v20 = vrot.slane %v3848_v47, %v3778_v11  ;;  %v794_v21 = vcombine.low %v772_v2, %v779_v12  ;;  %v3675_v47 = vmov 0.0   ;;  %v61_v54 = vld [vmem:[%s4642_s0 + $0xa] sm:$0x1]  ;;  %v65_v2 = vld [vmem:[%s4642_s0 + $0xe] sm:$0x1] }
  0x13   :  { %386 = vrot.lane.b32.xlu1 %v235_v38, %s3674_s25  ;;  %384 = vrot.lane.b32.xlu0 %v221_v39, %s3674_s25  ;;  %v795_v22 = vcombine.low %v786_v13, %v793_v14  ;;  %v347_v24 = vrot.slane %v340_v16, %v3778_v11  ;;  %v368_v27 = vrot.slane %v82_v58, %v3778_v11  ;;  %v55_v38 = vld [vmem:[%s4642_s0 + $0x4] sm:$0x1]  ;;  %v51_v39 = vld [vmem:[%s4642_s0] sm:$0x1] }
  0x14   :  { %1269 = vmatprep.subr.bf16.mxu1 %v3673_v3  ;;  %3340 = vmatprep.mubr.msk.bf16.mxu0 %vm408_vm0, %v761_v10  ;;  %v333_v26 = vrot.slane %v326_v20, %v3778_v11  ;;  %v354_v28 = vrot.slane %v80_v59, %v3778_v11  ;;  %v802_v29 = vrot.slane %v794_v21, %v3778_v11  ;;  %v67_v20 = vld [vmem:[%s4642_s0 + $0x10] sm:$0x1] }
  0x15   :  { %3335 = vmatpush3.bf16.msra.mxu0 %v3577_v0  ;;  %v809_v30 = vrot.slane %v795_v22, %v3778_v11  ;;  %v375_v32 = vrot.slane %v368_v27, %v3778_v11 }
  0x16   :  { %1270 = vmatpush1.bf16.msra.mxu1 %v3576_v7  ;;  %3336 = vmatprep.subr.bf16.mxu0 %v3579_v15  ;;  %v361_v33 = vrot.slane %v354_v28, %v3778_v11 }
  0x17   :  { %390 = vrot.lane.b32.xlu1 %v263_v51, %s3674_s25  ;;  %388 = vrot.lane.b32.xlu0 %v249_v52, %s3674_s25  ;;  %v810_v34 = vcombine.low %v802_v29, %v809_v30 }
  0x18   :  { %1271 = vmatprep.subr.bf16.mxu1 %v3673_v3 }
  0x19   :  { %3337 = vmatpush3.bf16.msra.mxu0 %v3579_v15 }
  0x1a   :  { %1272 = vmatpush1.bf16.msra.mxu1 %v3578_v17  ;;  %3338 = vmatprep.subr.bf16.mxu0 %v3581_v23 }
  0x1b   :  { %394 = vrot.lane.b32.xlu1 %v291_v8, %s3674_s25  ;;  %392 = vrot.lane.b32.xlu0 %v277_v9, %s3674_s25 }
  0x1c   :  { %1273 = vmatprep.subr.bf16.mxu1 %v3673_v3 }
  0x1d   :  { %3339 = vmatpush3.bf16.msra.mxu0 %v3581_v23 }
  0x1e   :  { %1274 = vmatpush1.bf16.msra.mxu1 %v3580_v25 }
  0x1f   :  { %398 = vrot.lane.b32.xlu1 %v319_v18, %s3674_s25  ;;  %396 = vrot.lane.b32.xlu0 %v305_v19, %s3674_s25  ;;  %v69_v19 = vld [vmem:[%s4642_s0 + $0x12] sm:$0x1] }
  0x20   :  { %1275 = vmatprep.subr.bf16.mxu1 %v3673_v3  ;;  %3341 = vmatmul.mubr.msk.bf16.vlgmr.msra.gmra.mrb[0].mxu0 %vm408_vm0, %v810_v34  ;;  %v71_v34 = vld [vmem:[%s4642_s0 + $0x14] sm:$0x1] }
  0x21   :  { %3376 = vmatprep.mubr.msk.f32.mxu0 %vm3678_vm2, %v3675_v47 }
  0x22   :  { %1276 = vmatpush1.bf16.msra.mxu1 %v3582_v31 }
  0x23   :  { %402 = vrot.lane.b32.xlu1 %v347_v24, %s3674_s25  ;;  %400 = vrot.lane.b32.xlu0 %v333_v26, %s3674_s25 }
  0x24   :  { %1277 = vmatprep.subr.bf16.mxu1 %v3673_v3 }
  0x26   :  { %1278 = vmatpush1.bf16.msra.mxu1 %v3583_v35 }
  0x27   :  { %406 = vrot.lane.b32.xlu1 %v375_v32, %s3674_s25  ;;  %404 = vrot.lane.b32.xlu0 %v361_v33, %s3674_s25  ;;  %v73_v33 = vld [vmem:[%s4642_s0 + $0x16] sm:$0x1] }
  0x28   :  { %1279 = vmatprep.subr.bf16.mxu1 %v3673_v3 }
  0x2a   :  { %1280 = vmatpush1.bf16.msra.mxu1 %v3584_v36 }
  0x2b   :  { %1281 = vmatprep.subr.bf16.mxu1 %v3673_v3  ;;  %v53_v3 = vld [vmem:[%s4642_s0 + $0x2] sm:$0x1] }
  0x2e   :  { %1282 = vmatpush1.bf16.msra.mxu1 %v3585_v37 }
  0x2f   :  { %3379 = vmatprep.subr.bf16.mxu1 %v3675_v47 }
  0x7d   :  { %v381_v40 = vpop.permute.xlu1 %380  ;;  %v377_v41 = vpop.permute.xlu0 %376 }
  0x7e   :  { %v417_v42 = vsel %vm408_vm0, %v55_v38, %v381_v40  ;;  %v411_v43 = vsel %vm408_vm0, %v51_v39, %v377_v41 }
  0x7f   :  { %v503_v48 = vcombine.low %v417_v42, %v381_v40  ;;  %v473_v49 = vcombine.low %v411_v43, %v377_v41 }
  0x81   :  { %v383_v45 = vpop.permute.xlu1 %382  ;;  %v379_v46 = vpop.permute.xlu0 %378  ;;  %v510_v60 = vrot.slane %v503_v48, %v3778_v11  ;;  %v480_v61 = vrot.slane %v473_v49, %v3778_v11  ;;  %v75_v48 = vld [vmem:[%s4642_s0 + $0x18] sm:$0x1] }
  0x82   :  { %v420_v50 = vsel %vm408_vm0, %v57_v44, %v383_v45  ;;  %v414_v51 = vsel %vm408_vm0, %v53_v3, %v379_v46 }
  0x83   :  { %v518_v52 = vcombine.low %v420_v50, %v383_v45  ;;  %v488_v53 = vcombine.low %v414_v51, %v379_v46  ;;  %v517_v13 = vrot.slane %v510_v60, %v3778_v11  ;;  %v487_v14 = vrot.slane %v480_v61, %v3778_v11  ;;  %v77_v46 = vld [vmem:[%s4642_s0 + $0x1a] sm:$0x1] }
  0x85   :  { %v525_v56 = vrot.slane %v518_v52, %v3778_v11  ;;  %v495_v57 = vrot.slane %v488_v53, %v3778_v11  ;;  %v387_v58 = vpop.permute.xlu1 %386  ;;  %v385_v59 = vpop.permute.xlu0 %384 }
  0x86   :  { %v426_v62 = vsel %vm408_vm0, %v61_v54, %v387_v58  ;;  %v423_v63 = vsel %vm408_vm0, %v59_v55, %v385_v59 }
  0x87   :  { %v548_v0 = vcombine.low %v426_v62, %v387_v58  ;;  %v533_v1 = vcombine.low %v423_v63, %v385_v59  ;;  %v532_v6 = vrot.slane %v525_v56, %v3778_v11  ;;  %v502_v7 = vrot.slane %v495_v57, %v3778_v11 }
  0x89   :  { %v555_v8 = vrot.slane %v548_v0, %v3778_v11  ;;  %v540_v9 = vrot.slane %v533_v1, %v3778_v11  ;;  %v391_v10 = vpop.permute.xlu1 %390  ;;  %v389_v12 = vpop.permute.xlu0 %388  ;;  %v974_v21 = vcombine.low %v517_v13, %v532_v6  ;;  %v973_v22 = vcombine.low %v487_v14, %v502_v7 }
  0x8a   :  { %v432_v15 = vsel %vm408_vm0, %v65_v2, %v391_v10  ;;  %v429_v16 = vsel %vm408_vm0, %v63_v5, %v389_v12  ;;  %v81_v2 = vld [vmem:[%s4642_s0 + $0x1e] sm:$0x1]  ;;  %v79_v5 = vld [vmem:[%s4642_s0 + $0x1c] sm:$0x1] }
  0x8b   :  { %v578_v17 = vcombine.low %v432_v15, %v391_v10  ;;  %v563_v18 = vcombine.low %v429_v16, %v389_v12  ;;  %v562_v23 = vrot.slane %v555_v8, %v3778_v11  ;;  %v547_v24 = vrot.slane %v540_v9, %v3778_v11 }
  0x8c   :  { %v983_v36 = vrot.slane %v973_v22, %v3778_v11  ;;  %v990_v37 = vrot.slane %v974_v21, %v3778_v11 }
  0x8d   :  { %v585_v25 = vrot.slane %v578_v17, %v3778_v11  ;;  %v570_v26 = vrot.slane %v563_v18, %v3778_v11  ;;  %v395_v27 = vpop.permute.xlu1 %394  ;;  %v393_v28 = vpop.permute.xlu0 %392  ;;  %v975_v35 = vcombine.low %v547_v24, %v562_v23 }
  0x8e   :  { %v438_v29 = vsel %vm408_vm0, %v69_v19, %v395_v27  ;;  %v435_v30 = vsel %vm408_vm0, %v67_v20, %v393_v28  ;;  %v1006_v51 = vcombine.high %v983_v36, %v990_v37  ;;  %v1005_v52 = vcombine.low %v983_v36, %v990_v37 }
  0x8f   :  { %v592_v31 = vrot.slane %v585_v25, %v3778_v11  ;;  %v577_v32 = vrot.slane %v570_v26, %v3778_v11  ;;  %v608_v39 = vcombine.low %v438_v29, %v395_v27  ;;  %v593_v40 = vcombine.low %v435_v30, %v393_v28 }
  0x90   :  { %v997_v49 = vrot.slane %v975_v35, %v3778_v11  ;;  %v1022_v7 = vrot.slane %v1006_v51, %v3778_v11  ;;  %v1015_v16 = vrot.slane %v1005_v52, %v3778_v11  ;;  %v119_v51 = vld [vmem:[%s4645_s7] sm:$0xff]  ;;  %v120_v52 = vld [vmem:[%s4645_s7 + $0x8] sm:$0xff] }
  0x91   :  { %v976_v38 = vcombine.low %v577_v32, %v592_v31  ;;  %v399_v41 = vpop.permute.xlu1 %398  ;;  %v397_v42 = vpop.permute.xlu0 %396  ;;  %v615_v53 = vrot.slane %v608_v39, %v3778_v11  ;;  %v600_v54 = vrot.slane %v593_v40, %v3778_v11 }
  0x92   :  { %v444_v43 = vsel %vm408_vm0, %v73_v33, %v399_v41  ;;  %v441_v44 = vsel %vm408_vm0, %v71_v34, %v397_v42 }
  0x93   :  { %v638_v3 = vcombine.low %v444_v43, %v399_v41  ;;  %v623_v45 = vcombine.low %v441_v44, %v397_v42  ;;  %v1004_v50 = vrot.slane %v976_v38, %v3778_v11  ;;  %v622_v10 = vrot.slane %v615_v53, %v3778_v11 }
  0x94   :  { %v607_v12 = vrot.slane %v600_v54, %v3778_v11  ;;  %v3677_v53 = vmov 0.0|0.0   ;;  %v3490_v54 = vpack.c.bf16 %v120_v52, %v119_v51 }
  0x95   :  { %v645_v55 = vrot.slane %v638_v3, %v3778_v11  ;;  %v630_v56 = vrot.slane %v623_v45, %v3778_v11  ;;  %v403_v57 = vpop.permute.xlu1 %402  ;;  %v401_v58 = vpop.permute.xlu0 %400  ;;  %v1008_v61 = vcombine.high %v997_v49, %v1004_v50  ;;  %v1007_v62 = vcombine.low %v997_v49, %v1004_v50  ;;  %3489 = vmatprep.subr.bf16.mxu0 %v3677_v53 }
  0x96   :  { %v450_v59 = vsel %vm408_vm0, %v77_v46, %v403_v57  ;;  %v447_v60 = vsel %vm408_vm0, %v75_v48, %v401_v58  ;;  %v1039_v27 = vcombine.low %v607_v12, %v622_v10  ;;  %v3676_v48 = vmov 1983009808   ;;  %3491 = vmatpush3.bf16.msra.mxu0 %v3490_v54 }
  0x97   :  { %v652_v63 = vrot.slane %v645_v55, %v3778_v11  ;;  %v637_v0 = vrot.slane %v630_v56, %v3778_v11  ;;  %v668_v1 = vcombine.low %v450_v59, %v403_v57  ;;  %v653_v6 = vcombine.low %v447_v60, %v401_v58  ;;  %v122_v55 = vld [vmem:[%s4645_s7 + $0x18] sm:$0xff]  ;;  %3492 = vmatprep.subr.bf16.mxu0 %v3677_v53 }
  0x98   :  { %v1036_v8 = vrot.slane %v1008_v61, %v3778_v11  ;;  %v1029_v9 = vrot.slane %v1007_v62, %v3778_v11  ;;  %v1049_v34 = vrot.slane %v1039_v27, %v3778_v11  ;;  %v908_v49 = vunpack.c.l.s4 %v3676_v48  ;;  %v125_v27 = vld [vmem:[%s4645_s7 + $0x30] sm:$0xff] }
  0x99   :  { %v675_v13 = vrot.slane %v668_v1, %v3778_v11  ;;  %v407_v14 = vpop.permute.xlu1 %406  ;;  %v405_v15 = vpop.permute.xlu0 %404  ;;  %v660_v17 = vrot.slane %v653_v6, %v3778_v11  ;;  %v1040_v21 = vcombine.low %v637_v0, %v652_v63  ;;  %v133_v48 = vld [vmem:[%s4645_s7 + $0x70] sm:$0xff] }
  0x9a   :  { %v456_v18 = vsel %vm408_vm0, %v81_v2, %v407_v14  ;;  %v453_v19 = vsel %vm408_vm0, %v79_v5, %v405_v15  ;;  %v1038_v20 = vcombine.low %v1022_v7, %v1036_v8  ;;  %v1037_v26 = vcombine.low %v1015_v16, %v1029_v9 }
  0x9b   :  { %v682_v22 = vrot.slane %v675_v13, %v3778_v11  ;;  %v698_v23 = vcombine.low %v456_v18, %v407_v14  ;;  %v683_v24 = vcombine.low %v453_v19, %v405_v15  ;;  %v667_v25 = vrot.slane %v660_v17, %v3778_v11  ;;  %v123_v17 = vld [vmem:[%s4645_s7 + $0x20] sm:$0xff]  ;;  %v124_v18 = vld [vmem:[%s4645_s7 + $0x28] sm:$0xff] }
  0x9c   :  { %3074 = vmatprep.mubr.msk.bf16.mxu1 %vm1252_vm1, %v1038_v20  ;;  %v1056_v30 = vrot.slane %v1040_v21, %v3778_v11  ;;  %v909_v50 = vunpack.c.0.s8 %v908_v49  ;;  %v134_v49 = vld [vmem:[%s4645_s7 + $0x78] sm:$0xff] }
  0x9d   :  { %v705_v28 = vrot.slane %v698_v23, %v3778_v11  ;;  %v690_v29 = vrot.slane %v683_v24, %v3778_v11  ;;  %1292 = vmatmul.mubr.bf16.vlgmr.msra.gmra.mrb[0].mxu1 %v1037_v26  ;;  %v1041_v31 = vcombine.low %v667_v25, %v682_v22  ;;  %v3496_v24 = vpack.c.bf16 %v124_v18, %v123_v17 }
  0x9e   :  { %v1072_v38 = vcombine.high %v1049_v34, %v1056_v30  ;;  %v1071_v39 = vcombine.low %v1049_v34, %v1056_v30  ;;  %v4073_v56 = vsub.s32 %v909_v50, %v3760_v4  ;;  %v3511_v50 = vpack.c.bf16 %v134_v49, %v133_v48  ;;  %v3600_v48 = vld [vmem:[%s4647_s3 + $0x60] sm:$0xff]  }
  0x9f   :  { %v712_v32 = vrot.slane %v705_v28, %v3778_v11  ;;  %v697_v33 = vrot.slane %v690_v29, %v3778_v11  ;;  %v1063_v36 = vrot.slane %v1041_v31, %v3778_v11  ;;  %v126_v28 = vld [vmem:[%s4645_s7 + $0x38] sm:$0xff]  ;;  %v3601_v49 = vld [vmem:[%s4647_s3 + $0x20] sm:$0xff]  }
  0xa0   :  { %v1088_v42 = vrot.slane %v1072_v38, %v3778_v11  ;;  %v1081_v44 = vrot.slane %v1071_v39, %v3778_v11  ;;  %v3499_v34 = vpack.c.bf16 %v126_v28, %v125_v27  ;;  %v128_v38 = vld [vmem:[%s4645_s7 + $0x48] sm:$0xff] }
  0xa1   :  { %v1042_v35 = vcombine.low %v697_v33, %v712_v32 }
  0xa3   :  { %v1070_v37 = vrot.slane %v1042_v35, %v3778_v11 }
  0xa5   :  { %v1074_v40 = vcombine.high %v1063_v36, %v1070_v37  ;;  %v1073_v41 = vcombine.low %v1063_v36, %v1070_v37  ;;  %v127_v37 = vld [vmem:[%s4645_s7 + $0x40] sm:$0xff] }
  0xa7   :  { %v1102_v43 = vrot.slane %v1074_v40, %v3778_v11  ;;  %v1095_v3 = vrot.slane %v1073_v41, %v3778_v11  ;;  %v121_v11 = vld [vmem:[%s4645_s7 + $0x10] sm:$0xff]  ;;  %v3502_v41 = vpack.c.bf16 %v128_v38, %v127_v37  ;;  %v3589_v37 = vld [vmem:[%s4647_s3] sm:$0xff]  }
  0xa8   :  { %v3493_v58 = vpack.c.bf16 %v122_v55, %v121_v11  ;;  %v3590_v38 = vld [vmem:[%s4646_s4 + $0x10] sm:$0xff]  }
  0xa9   :  { %v1104_v45 = vcombine.low %v1088_v42, %v1102_v43  ;;  %v1103_v46 = vcombine.low %v1081_v44, %v1095_v3  ;;  %v129_v42 = vld [vmem:[%s4645_s7 + $0x50] sm:$0xff]  ;;  %v130_v43 = vld [vmem:[%s4645_s7 + $0x58] sm:$0xff]  ;;  %v131_v3 = vld [vmem:[%s4645_s7 + $0x60] sm:$0xff] }
  0xaa   :  { %3494 = vmatpush3.bf16.msra.mxu0 %v3493_v58  ;;  %v3505_v44 = vpack.c.bf16 %v130_v43, %v129_v42  ;;  %v3594_v42 = vld [vmem:[%s4647_s3 + $0x50] sm:$0xff]  }
  0xab   :  { %3075 = vmatprep.mubr.msk.bf16.mxu1 %vm1252_vm1, %v1104_v45  ;;  %3495 = vmatprep.subr.bf16.mxu0 %v3677_v53  ;;  %v132_v45 = vld [vmem:[%s4645_s7 + $0x68] sm:$0xff]  ;;  %v3595_v43 = vld [vmem:[%s4647_s3 + $0x10] sm:$0xff]  }
  0xac   :  { %1300 = vmatmul.mubr.bf16.gmra.mrb[4].mxu1 %v1103_v46  ;;  %v3508_v46 = vpack.c.bf16 %v132_v45, %v131_v3  ;;  %v3597_v3 = vld [vmem:[%s4647_s3 + $0x58] sm:$0xff]  }
  0xad   :  { %3395 = vmatprep.mubr.msk.bf16.mxu1 %vm3678_vm2, %v3675_v47  ;;  %v3598_v45 = vld [vmem:[%s4647_s3 + $0x18] sm:$0xff]  }
  0xae   :  { %3497 = vmatpush3.bf16.msra.mxu0 %v3496_v24 }
  0xaf   :  { %3498 = vmatprep.subr.bf16.mxu0 %v3677_v53 }
  0xb2   :  { %3500 = vmatpush3.bf16.msra.mxu0 %v3499_v34  ;;  %v3586_v34 = vld [vmem:[%s4646_s4] sm:$0xff]  }
  0xb3   :  { %3501 = vmatprep.subr.bf16.mxu0 %v3677_v53  ;;  %3380 = vmatpush3.bf16.msra.mxu1 %v3586_v34 }
  0xb4   :  { %3381 = vmatprep.subr.bf16.mxu1 %v3675_v47 }
  0xb6   :  { %3503 = vmatpush3.bf16.msra.mxu0 %v3502_v41  ;;  %v3593_v41 = vld [vmem:[%s4646_s4 + $0x18] sm:$0xff]  }
  0xb7   :  { %3504 = vmatprep.subr.bf16.mxu0 %v3677_v53 }
  0xba   :  { %3506 = vmatpush3.bf16.msra.mxu0 %v3505_v44  ;;  %v3596_v44 = vld [vmem:[%s4646_s4 + $0x20] sm:$0xff]  }
  0xbb   :  { %3507 = vmatprep.subr.bf16.mxu0 %v3677_v53 }
  0xbe   :  { %3509 = vmatpush3.bf16.msra.mxu0 %v3508_v46  ;;  %v3599_v46 = vld [vmem:[%s4646_s4 + $0x28] sm:$0xff]  }
  0xbf   :  { %3510 = vmatprep.subr.bf16.mxu0 %v3677_v53 }
  0xc2   :  { %3512 = vmatpush3.bf16.msra.mxu0 %v3511_v50  ;;  %v3602_v50 = vld [vmem:[%s4646_s4 + $0x30] sm:$0xff]  }
  0xf3   :  { %v3342_v57 = vpop.f32.mrb[0].mxu0 }
  0xf4   :  { %v940_v59 = vcombine.high %v3342_v57, %v3342_v57  ;;  %v947_v60 = vrot.slane %v3342_v57, %v4073_v56  ;;  %v4076_v61 = vpop.f32.mrb[1].mxu0 }
  0xf5   :  { %v906_v62 = vcombine.high %v4076_v61, %v4076_v61  ;;  %v3343_v63 = vpop.f32.mrb[2].mxu0  ;;  %v913_v51 = vrot.slane %v4076_v61, %v4073_v56 }
  0xf6   :  { %v954_v0 = vrot.slane %v940_v59, %v4073_v56  ;;  %v955_v1 = vcombine.high %v947_v60, %v947_v60  ;;  %v957_v2 = vcombine.high %v3343_v63, %v3343_v63  ;;  %v964_v5 = vrot.slane %v3343_v63, %v4073_v56  ;;  %v890_v6 = vpop.f32.mrb[3].mxu0 }
  0xf7   :  { %v920_v7 = vrot.slane %v906_v62, %v4073_v56  ;;  %v923_v8 = vcombine.high %v890_v6, %v890_v6  ;;  %v930_v15 = vrot.slane %v890_v6, %v4073_v56  ;;  %v921_v52 = vcombine.high %v913_v51, %v913_v51 }
  0xf8   :  { %v956_v9 = vcombine.high %v954_v0, %v954_v0  ;;  %v971_v10 = vrot.slane %v957_v2, %v4073_v56  ;;  %v972_v12 = vcombine.high %v964_v5, %v964_v5  ;;  %v1215_v13 = vcombine.low %v955_v1, %v954_v0 }
  0xf9   :  { %v922_v14 = vcombine.high %v920_v7, %v920_v7  ;;  %v937_v16 = vrot.slane %v923_v8, %v4073_v56  ;;  %v938_v21 = vcombine.high %v930_v15, %v930_v15  ;;  %v1180_v11 = vcombine.low %v3675_v47, %v913_v51  ;;  %v3603_v51 = vld [vmem:[%s4647_s3 + $0x68] sm:$0xff]  }
  0xfa   :  { %v1231_v19 = vcombine.low %v956_v9, %v964_v5  ;;  %v1232_v20 = vcombine.low %v972_v12, %v971_v10  ;;  %v1229_v32 = vrot.slane %v1215_v13, %v4073_v56  ;;  %v1181_v54 = vcombine.low %v921_v52, %v920_v7  ;;  %v3604_v52 = vld [vmem:[%s4647_s3 + $0x28] sm:$0xff]  }
  0xfb   :  { %v939_v22 = vcombine.high %v937_v16, %v937_v16  ;;  %v1197_v23 = vcombine.low %v922_v14, %v930_v15  ;;  %v1198_v29 = vcombine.low %v938_v21, %v937_v16  ;;  %v1188_v55 = vrot.slane %v1180_v11, %v4073_v56  ;;  %v3605_v11 = vld [vmem:[%s4646_s4 + $0x38] sm:$0xff]  }
  0xfc   :  { %v1239_v25 = vrot.slane %v1231_v19, %v4073_v56  ;;  %v1246_v26 = vrot.slane %v1232_v20, %v4073_v56  ;;  %v1195_v57 = vrot.slane %v1181_v54, %v4073_v56  ;;  %v3606_v54 = vld [vmem:[%s4647_s3 + $0x70] sm:$0xff]  }
  0xfd   :  { %v1205_v30 = vrot.slane %v1197_v23, %v4073_v56  ;;  %v1214_v31 = vcombine.low %v939_v22, %v947_v60  ;;  %v1212_v35 = vrot.slane %v1198_v29, %v4073_v56 }
  0xfe   :  { %v1247_v33 = vcombine.low %v1239_v25, %v1246_v26  ;;  %v1196_v58 = vcombine.low %v1188_v55, %v1195_v57  ;;  %v3607_v55 = vld [vmem:[%s4647_s3 + $0x30] sm:$0xff]   ;;  %v3608_v57 = vld [vmem:[%s4647_s3 + $0x78] sm:$0xff]  }
  0xff   :  { %v1222_v36 = vrot.slane %v1214_v31, %v4073_v56  ;;  %v1213_v39 = vcombine.low %v1205_v30, %v1212_v35  ;;  %v3587_v35 = vld [vmem:[%s4646_s4 + $0x8] sm:$0xff]  }
 0x100   :  { %3382 = vmatpush3.bf16.msra.mxu1 %v3587_v35 }
 0x101   :  { %v1230_v40 = vcombine.low %v1222_v36, %v1229_v32  ;;  %v3588_v36 = vld [vmem:[%s4647_s3 + $0x40] sm:$0xff]   ;;  %3383 = vmatprep.subr.bf16.mxu1 %v3675_v47 }
 0x102   :  { %3197 = vmatprep.subr.bf16.mxu0 %v3588_v36 }
 0x104   :  { %3384 = vmatpush3.bf16.msra.mxu1 %v3590_v38 }
 0x105   :  { %3385 = vmatprep.subr.bf16.mxu1 %v3675_v47 }
 0x108   :  { %3386 = vmatpush3.bf16.msra.mxu1 %v3593_v41 }
 0x109   :  { %3387 = vmatprep.subr.bf16.mxu1 %v3675_v47 }
 0x10c   :  { %3388 = vmatpush3.bf16.msra.mxu1 %v3596_v44 }
 0x10d   :  { %3389 = vmatprep.subr.bf16.mxu1 %v3675_v47 }
 0x110   :  { %3390 = vmatpush3.bf16.msra.mxu1 %v3599_v46 }
 0x111   :  { %3391 = vmatprep.subr.bf16.mxu1 %v3675_v47 }
 0x114   :  { %3392 = vmatpush3.bf16.msra.mxu1 %v3602_v50 }
 0x115   :  { %3393 = vmatprep.subr.bf16.mxu1 %v3675_v47 }
 0x118   :  { %3394 = vmatpush3.bf16.msra.mxu1 %v3605_v11 }
 0x119   :  { %3513 = vmatprep.subr.bf16.mxu1 %v3677_v53 }
 0x170   :  { %v1293_v59 = vpop.f32.mrb[0].mxu1 }
 0x171   :  { %v4144_v60 = vadd.f32 %v1293_v59, %v1196_v58  ;;  %v1295_v62 = vpop.f32.mrb[1].mxu1  ;;  %v3609_v58 = vld [vmem:[%s4647_s3 + $0x38] sm:$0xff]  }
 0x172   :  { %v1296_v63 = vpop.f32.mrb[2].mxu1 }
 0x173   :  { %v4146_v0 = vadd.f32 %v1296_v63, %v1213_v39  ;;  %v1298_v1 = vpop.f32.mrb[3].mxu1  ;;  %v1317_v5 = vmul.f32 %v4144_v60, %v4144_v60  ;;  %v3591_v39 = vld [vmem:[%s4647_s3 + $0x48] sm:$0xff]  }
 0x175   :  { %v1318_v61 = vmul.f32 %v4146_v0, %v4146_v0  ;;  %v1308_v6 = vadd.f32 %v4146_v0, %v4144_v60 }
 0x177   :  { %v1321_v10 = vadd.f32 %v1318_v61, %v1317_v5 }
 0x17f   :  { %v1301_v2 = vpop.f32.mrb[4].mxu1 }
 0x180   :  { %v4154_v7 = vadd.f32 %v1301_v2, %v1230_v40  ;;  %v1303_v8 = vpop.f32.mrb[5].mxu1  ;;  %v3592_v40 = vld [vmem:[%s4647_s3 + $0x8] sm:$0xff]  }
 0x181   :  { %v1304_v9 = vpop.f32.mrb[6].mxu1 }
 0x182   :  { %v1309_v12 = vadd.f32 %v1308_v6, %v4154_v7  ;;  %v1319_v13 = vmul.f32 %v4154_v7, %v4154_v7  ;;  %v4159_v14 = vadd.f32 %v1304_v9, %v1247_v33  ;;  %v1306_v15 = vpop.f32.mrb[7].mxu1  ;;  %v135_v6 = vld [vmem:[%s4648_s10] sm:$0x3]  ;;  %v4250_v9 = vsub.s32 0, %v3760_v4 }
 0x184   :  { %v1322_v16 = vadd.f32 %v1321_v10, %v1319_v13  ;;  %v1310_v17 = vadd.f32 %v1309_v12, %v4159_v14  ;;  %v1320_v18 = vmul.f32 %v4159_v14, %v4159_v14 }
 0x186   :  { %v1311_v19 = vrot.slane %v1310_v17, 4  ;;  %v1323_v20 = vadd.f32 %v1322_v16, %v1320_v18  ;;  %v4254_v16 = vsub.s32 1, %v3760_v4 }
 0x188   :  { %v1312_v21 = vadd.f32 %v1311_v19, %v1310_v17  ;;  %v1324_v22 = vrot.slane %v1323_v20, 4 }
 0x18a   :  { %v1313_v23 = vrot.slane %v1312_v21, 2  ;;  %v1325_v24 = vadd.f32 %v1324_v22, %v1323_v20 }
 0x18c   :  { %v1314_v25 = vadd.f32 %v1313_v23, %v1312_v21  ;;  %v1326_v26 = vrot.slane %v1325_v24, 2 }
 0x18e   :  { %v1315_v27 = vrot.slane %v1314_v25, 1  ;;  %v1327_v28 = vadd.f32 %v1326_v26, %v1325_v24 }
 0x190   :  { %v1328_v29 = vrot.slane %v1327_v28, 1  ;;  %v1316_v30 = vadd.f32 %v1315_v27, %v1314_v25 }
 0x192   :  { %v1329_v31 = vadd.f32 %v1328_v29, %v1327_v28 }
 0x194   :  { %v1331_v32 = vsel %vm1330_vm3, %v1316_v30, %v1329_v31 }
 0x195   :  { %v1332_v33 = vmul.f32 0.03125, %v1331_v32 }
 0x197   :  { %3377 = vmatmul.mubr.f32.vlgmr.msra.gmra.mrb[4].mxu0 %v1332_v33 }
 0x198   :  { %3198 = vmatpush3.bf16.msra.mxu0 %v3589_v37 }
 0x199   :  { %3199 = vmatprep.subr.bf16.mxu0 %v3591_v39 }
 0x19c   :  { %3200 = vmatpush3.bf16.msra.mxu0 %v3592_v40 }
 0x19d   :  { %3201 = vmatprep.subr.bf16.mxu0 %v3594_v42 }
 0x1a0   :  { %3202 = vmatpush3.bf16.msra.mxu0 %v3595_v43 }
 0x1a1   :  { %3203 = vmatprep.subr.bf16.mxu0 %v3597_v3 }
 0x1a4   :  { %3204 = vmatpush3.bf16.msra.mxu0 %v3598_v45 }
 0x1a5   :  { %3205 = vmatprep.subr.bf16.mxu0 %v3600_v48 }
 0x1a8   :  { %3206 = vmatpush3.bf16.msra.mxu0 %v3601_v49 }
 0x1a9   :  { %3207 = vmatprep.subr.bf16.mxu0 %v3603_v51 }
 0x1ac   :  { %3208 = vmatpush3.bf16.msra.mxu0 %v3604_v52 }
 0x1ad   :  { %3209 = vmatprep.subr.bf16.mxu0 %v3606_v54 }
 0x1b0   :  { %3210 = vmatpush3.bf16.msra.mxu0 %v3607_v55 }
 0x1b1   :  { %3211 = vmatprep.subr.bf16.mxu0 %v3608_v57 }
 0x1b4   :  { %3212 = vmatpush3.bf16.msra.mxu0 %v3609_v58 }
 0x1b5   :  { %3434 = vmatprep.subr.bf16.mxu0 %v3675_v47 }
 0x26a   :  { %v1399_v59 = vpop.f32.mrb[4].mxu0 }
 0x26b   :  { %v1403_v62 = vmul.f32 %v1399_v59, %v1399_v59  ;;  %v3378_v63 = vpop.f32.mrb[5].mxu0 }
 0x26d   :  { %v1405_v1 = vrot.slane %v1403_v62, 7 }
 0x26f   :  { %v1407_v61 = vsub.f32 %v1399_v59, %v1405_v1 }
 0x271   :  { %v1408_v2 = vadd.f32 1e-05, %v1407_v61 }
 0x273   :  { %3666 = vrsqrt.f32 %v1408_v2 }
 0x27d   :  { %v3667_v5 = vpop.eup %3666 }
 0x27e   :  { %v1411_v8 = vrot.slane %v3667_v5, 1 }
 0x280   :  { %v1413_v10 = vmul.f32 %v1411_v8, %v135_v6 }
 0x282   :  { %v1414_v12 = vmul.f32 %v1413_v10, %v1399_v59  ;;  %v1422_v13 = vrot.slane %v1413_v10, %v4250_v9 }
 0x284   :  { %v1416_v15 = vrot.slane %v1414_v12, 7  ;;  %v1423_v18 = vmul.f32 %v1422_v13, %v4144_v60  ;;  %v1424_v19 = vmul.f32 %v1422_v13, %v4146_v0  ;;  %v1425_v20 = vmul.f32 %v1422_v13, %v4154_v7 }
 0x285   :  { %v1426_v21 = vmul.f32 %v1422_v13, %v4159_v14 }
 0x286   :  { %v1418_v17 = vsub.f32 %v135_v6, %v1416_v15 }
 0x288   :  { %v1430_v22 = vrot.slane %v1418_v17, %v4254_v16 }
 0x28a   :  { %v1431_v23 = vadd.f32 %v1430_v22, %v1423_v18  ;;  %v1432_v24 = vadd.f32 %v1430_v22, %v1424_v19  ;;  %v1433_v25 = vadd.f32 %v1430_v22, %v1425_v20  ;;  %v1434_v26 = vadd.f32 %v1430_v22, %v1426_v21 }
 0x28c   :  { %v1435_v27 = vmax.f32 %v1431_v23, 0.0  ;;  %v1436_v28 = vmax.f32 %v1432_v24, 0.0  ;;  %v1437_v29 = vmax.f32 %v1433_v25, 0.0  ;;  %v1438_v4 = vmax.f32 %v1434_v26, 0.0 }
 0x28e   :  { %v1508_v30 = vcombine.high %v1435_v27, %v1435_v27  ;;  %v1515_v31 = vrot.slane %v1435_v27, %v4073_v56  ;;  %v1525_v60 = vcombine.high %v1436_v28, %v1436_v28  ;;  %v1532_v0 = vrot.slane %v1436_v28, %v4073_v56 }
 0x28f   :  { %v1542_v32 = vcombine.high %v1437_v29, %v1437_v29  ;;  %v1549_v7 = vrot.slane %v1437_v29, %v4073_v56  ;;  %v1559_v14 = vcombine.high %v1438_v4, %v1438_v4  ;;  %v1566_v33 = vrot.slane %v1438_v4, %v4073_v56 }
 0x290   :  { %v1522_v34 = vrot.slane %v1508_v30, %v4073_v56  ;;  %v1539_v35 = vrot.slane %v1525_v60, %v4073_v56  ;;  %v1523_v36 = vcombine.high %v1515_v31, %v1515_v31  ;;  %v1540_v37 = vcombine.high %v1532_v0, %v1532_v0  ;;  %v1487_v60 = vld [vmem:[%s4649_s8] sm:$0xff] }
 0x291   :  { %v1556_v38 = vrot.slane %v1542_v32, %v4073_v56  ;;  %v1573_v39 = vrot.slane %v1559_v14, %v4073_v56  ;;  %v1557_v40 = vcombine.high %v1549_v7, %v1549_v7  ;;  %v1574_v41 = vcombine.high %v1566_v33, %v1566_v33  ;;  %v1490_v14 = vld [vmem:[%s4649_s8 + $0x18] sm:$0xff] }
 0x292   :  { %v3076_v42 = vcombine.high %v1515_v31, %v1522_v34  ;;  %v3077_v43 = vcombine.high %v1532_v0, %v1539_v35  ;;  %v1524_v44 = vcombine.high %v1522_v34, %v1522_v34  ;;  %v1541_v3 = vcombine.high %v1539_v35, %v1539_v35 }
 0x293   :  { %v3078_v45 = vcombine.high %v1549_v7, %v1556_v38  ;;  %v3079_v46 = vcombine.high %v1566_v33, %v1573_v39  ;;  %v1558_v48 = vcombine.high %v1556_v38, %v1556_v38  ;;  %v1575_v49 = vcombine.high %v1573_v39, %v1573_v39 }
 0x294   :  { %v1690_v50 = vrot.slane %v3076_v42, %v4073_v56  ;;  %v1697_v51 = vrot.slane %v3077_v43, %v4073_v56  ;;  %v1576_v52 = vcombine.low %v1515_v31, %v1523_v36  ;;  %v1584_v11 = vcombine.low %v1522_v34, %v1524_v44  ;;  %v1491_v34 = vld [vmem:[%s4649_s8 + $0x20] sm:$0xff]  ;;  %v1497_v43 = vld [vmem:[%s4649_s8 + $0x50] sm:$0xff]  ;;  %v1498_v44 = vld [vmem:[%s4649_s8 + $0x58] sm:$0xff] }
 0x295   :  { %v1707_v54 = vrot.slane %v3078_v45, %v4073_v56  ;;  %v1714_v55 = vrot.slane %v3079_v46, %v4073_v56  ;;  %v1592_v57 = vcombine.low %v1532_v0, %v1540_v37  ;;  %v1600_v58 = vcombine.low %v1539_v35, %v1541_v3  ;;  %v1488_v0 = vld [vmem:[%s4649_s8 + $0x8] sm:$0xff]  ;;  %v1493_v37 = vld [vmem:[%s4649_s8 + $0x30] sm:$0xff]  ;;  %v1499_v45 = vld [vmem:[%s4649_s8 + $0x60] sm:$0xff] }
 0x296   :  { %v1698_v59 = vcombine.low %v1690_v50, %v1697_v51  ;;  %v1583_v62 = vrot.slane %v1576_v52, %v4073_v56  ;;  %v1591_v63 = vrot.slane %v1584_v11, %v4073_v56  ;;  %v1608_v1 = vcombine.low %v1549_v7, %v1557_v40  ;;  %v1489_v7 = vld [vmem:[%s4649_s8 + $0x10] sm:$0xff]  ;;  %v1492_v35 = vld [vmem:[%s4649_s8 + $0x28] sm:$0xff]  ;;  %v1495_v40 = vld [vmem:[%s4649_s8 + $0x40] sm:$0xff] }
 0x297   :  { %v1715_v61 = vcombine.low %v1707_v54, %v1714_v55  ;;  %v1599_v2 = vrot.slane %v1592_v57, %v4073_v56  ;;  %v1607_v5 = vrot.slane %v1600_v58, %v4073_v56  ;;  %v1616_v6 = vcombine.low %v1556_v38, %v1558_v48  ;;  %v1494_v38 = vld [vmem:[%s4649_s8 + $0x38] sm:$0xff]  ;;  %v1500_v46 = vld [vmem:[%s4649_s8 + $0x68] sm:$0xff] }
 0x298   :  { %v1624_v8 = vcombine.low %v1566_v33, %v1574_v41  ;;  %v1632_v10 = vcombine.low %v1573_v39, %v1575_v49  ;;  %v1640_v12 = vcombine.low %v1583_v62, %v1591_v63  ;;  %v1615_v15 = vrot.slane %v1608_v1, %v4073_v56  ;;  %v1496_v41 = vld [vmem:[%s4649_s8 + $0x48] sm:$0xff]  ;;  %v1501_v49 = vld [vmem:[%s4649_s8 + $0x70] sm:$0xff]  ;;  %v1502_v50 = vld [vmem:[%s4649_s8 + $0x78] sm:$0xff] }
 0x299   :  { %v1718_v13 = vpack.c.bf16 %v1715_v61, %v1698_v59  ;;  %v1623_v17 = vrot.slane %v1616_v6, %v4073_v56  ;;  %v1641_v18 = vcombine.low %v1599_v2, %v1607_v5  ;;  %v3514_v32 = vpack.c.bf16 %v1488_v0, %v1487_v60 }
 0x29a   :  { %v1631_v19 = vrot.slane %v1624_v8, %v4073_v56  ;;  %v1639_v20 = vrot.slane %v1632_v10, %v4073_v56  ;;  %v1648_v21 = vrot.slane %v1640_v12, %v4073_v56  ;;  %v3517_v33 = vpack.c.bf16 %v1490_v14, %v1489_v7 }
 0x29b   :  { %3396 = vmatmul.mubr.bf16.vlgmr.msra.gmra.mrb[8].mxu1 %v1718_v13  ;;  %v1655_v22 = vrot.slane %v1641_v18, %v4073_v56  ;;  %v1658_v23 = vcombine.low %v1615_v15, %v1623_v17  ;;  %v3520_v36 = vpack.c.bf16 %v1492_v35, %v1491_v34  ;;  %v3523_v39 = vpack.c.bf16 %v1494_v38, %v1493_v37 }
 0x29c   :  { %v1659_v24 = vcombine.low %v1631_v19, %v1639_v20  ;;  %3431 = vmatprep.mubr.msk.f32.mxu1 %vm3678_vm2, %v3675_v47  ;;  %3515 = vmatpush3.bf16.msra.mxu1 %v3514_v32  ;;  %v3526_v42 = vpack.c.bf16 %v1496_v41, %v1495_v40  ;;  %v3529_v3 = vpack.c.bf16 %v1498_v44, %v1497_v43  ;;  %v3611_v43 = vld [vmem:[%s4650_s6 + $0x8] sm:$0xff]   ;;  %v3612_v44 = vld [vmem:[%s4651_s5 + $0x40] sm:$0xff]  }
 0x29d   :  { %v1666_v25 = vrot.slane %v1658_v23, %v4073_v56  ;;  %v1657_v26 = vcombine.high %v1648_v21, %v1655_v22  ;;  %v1656_v28 = vcombine.low %v1648_v21, %v1655_v22  ;;  %3516 = vmatprep.subr.bf16.mxu1 %v3677_v53  ;;  %v3532_v48 = vpack.c.bf16 %v1500_v46, %v1499_v45  ;;  %v3614_v45 = vld [vmem:[%s4650_s6 + $0x10] sm:$0xff]   ;;  %v3615_v46 = vld [vmem:[%s4651_s5 + $0x48] sm:$0xff]  }
 0x29e   :  { %v1673_v27 = vrot.slane %v1659_v24, %v4073_v56  ;;  %v3535_v51 = vpack.c.bf16 %v1502_v50, %v1501_v49  ;;  %v3617_v49 = vld [vmem:[%s4650_s6 + $0x18] sm:$0xff]   ;;  %v3618_v50 = vld [vmem:[%s4651_s5 + $0x50] sm:$0xff]  }
 0x2a0   :  { %v1675_v29 = vcombine.high %v1666_v25, %v1673_v27  ;;  %v1674_v4 = vcombine.low %v1666_v25, %v1673_v27  ;;  %3518 = vmatpush3.bf16.msra.mxu1 %v3517_v33 }
 0x2a1   :  { %3519 = vmatprep.subr.bf16.mxu1 %v3677_v53 }
 0x2a2   :  { %v1681_v30 = vpack.c.bf16 %v1675_v29, %v1657_v26  ;;  %v1680_v31 = vpack.c.bf16 %v1674_v4, %v1656_v28 }
 0x2a4   :  { %2007 = vmatprep.mubr.bf16.mxu0 %v1681_v30  ;;  %3521 = vmatpush3.bf16.msra.mxu1 %v3520_v36 }
 0x2a5   :  { %2008 = vmatmul.mubr.bf16.vlgmr.msra.gmra.mrb[8].mxu0 %v1680_v31  ;;  %3522 = vmatprep.subr.bf16.mxu1 %v3677_v53 }
 0x2a6   :  { %3450 = vmatprep.mubr.msk.bf16.mxu0 %vm3678_vm2, %v3675_v47 }
 0x2a8   :  { %3524 = vmatpush3.bf16.msra.mxu1 %v3523_v39 }
 0x2a9   :  { %3525 = vmatprep.subr.bf16.mxu1 %v3677_v53 }
 0x2ac   :  { %3527 = vmatpush3.bf16.msra.mxu1 %v3526_v42  ;;  %v3610_v42 = vld [vmem:[%s4650_s6] sm:$0xff]  }
 0x2ad   :  { %3528 = vmatprep.subr.bf16.mxu1 %v3677_v53  ;;  %3435 = vmatpush3.bf16.msra.mxu0 %v3610_v42 }
 0x2ae   :  { %3436 = vmatprep.subr.bf16.mxu0 %v3675_v47 }
 0x2b0   :  { %3530 = vmatpush3.bf16.msra.mxu1 %v3529_v3  ;;  %v3613_v3 = vld [vmem:[%s4651_s5] sm:$0xff]  }
 0x2b1   :  { %3531 = vmatprep.subr.bf16.mxu1 %v3677_v53  ;;  %3437 = vmatpush3.bf16.msra.mxu0 %v3611_v43 }
 0x2b2   :  { %3438 = vmatprep.subr.bf16.mxu0 %v3675_v47 }
 0x2b4   :  { %3533 = vmatpush3.bf16.msra.mxu1 %v3532_v48  ;;  %v3616_v48 = vld [vmem:[%s4651_s5 + $0x8] sm:$0xff]  }
 0x2b5   :  { %3534 = vmatprep.subr.bf16.mxu1 %v3677_v53  ;;  %3439 = vmatpush3.bf16.msra.mxu0 %v3614_v45  ;;  %v2182_v45 = vld [vmem:[%s4653_s9] sm:$0xff] }
 0x2b6   :  { %3440 = vmatprep.subr.bf16.mxu0 %v3675_v47 }
 0x2b8   :  { %3536 = vmatpush3.bf16.msra.mxu1 %v3535_v51  ;;  %v3619_v51 = vld [vmem:[%s4651_s5 + $0x10] sm:$0xff]  }
 0x2b9   :  { %3245 = vmatprep.subr.bf16.mxu1 %v3612_v44  ;;  %3441 = vmatpush3.bf16.msra.mxu0 %v3617_v49 }
 0x2ba   :  { %3442 = vmatprep.subr.bf16.mxu0 %v3675_v47 }
 0x36e   :  { %v1801_v52 = vpop.f32.mrb[8].mxu1 }
 0x36f   :  { %v1810_v11 = vcombine.high %v1801_v52, %v1801_v52  ;;  %v1817_v54 = vrot.slane %v1801_v52, %v4073_v56  ;;  %v3397_v55 = vpop.f32.mrb[9].mxu1  ;;  %v3620_v52 = vld [vmem:[%s4650_s6 + $0x20] sm:$0xff]  }
 0x370   :  { %v1804_v57 = vpop.f32.mrb[10].mxu1  ;;  %3443 = vmatpush3.bf16.msra.mxu0 %v3620_v52  ;;  %v3623_v55 = vld [vmem:[%s4650_s6 + $0x28] sm:$0xff]  }
 0x371   :  { %v1824_v58 = vrot.slane %v1810_v11, %v4073_v56  ;;  %v1825_v59 = vcombine.high %v1817_v54, %v1817_v54  ;;  %v1827_v62 = vcombine.high %v1804_v57, %v1804_v57  ;;  %v3398_v63 = vpop.f32.mrb[11].mxu1  ;;  %v1939_v1 = vcombine.low %v3675_v47, %v1817_v54  ;;  %v3621_v11 = vld [vmem:[%s4651_s5 + $0x58] sm:$0xff]   ;;  %3444 = vmatprep.subr.bf16.mxu0 %v3675_v47 }
 0x372   :  { %v1834_v61 = vrot.slane %v1804_v57, %v4073_v56  ;;  %v3622_v54 = vld [vmem:[%s4651_s5 + $0x18] sm:$0xff]   ;;  %v3624_v57 = vld [vmem:[%s4651_s5 + $0x60] sm:$0xff]   ;;  %v3628_v63 = vld [vmem:[%s4651_s5 + $0x28] sm:$0xff]  }
 0x373   :  { %v1940_v2 = vcombine.low %v1825_v59, %v1824_v58  ;;  %v1826_v5 = vcombine.high %v1824_v58, %v1824_v58  ;;  %v1841_v6 = vrot.slane %v1827_v62, %v4073_v56  ;;  %v1947_v13 = vrot.slane %v1939_v1, %v4073_v56  ;;  %v3625_v58 = vld [vmem:[%s4651_s5 + $0x20] sm:$0xff]   ;;  %v3626_v59 = vld [vmem:[%s4650_s6 + $0x30] sm:$0xff]   ;;  %v3627_v62 = vld [vmem:[%s4651_s5 + $0x68] sm:$0xff]  }
 0x374   :  { %v1842_v8 = vcombine.high %v1834_v61, %v1834_v61  ;;  %3445 = vmatpush3.bf16.msra.mxu0 %v3623_v55  ;;  %v3629_v1 = vld [vmem:[%s4650_s6 + $0x38] sm:$0xff]  }
 0x375   :  { %v1956_v10 = vcombine.low %v1826_v5, %v1834_v61  ;;  %v1954_v12 = vrot.slane %v1940_v2, %v4073_v56  ;;  %3446 = vmatprep.subr.bf16.mxu0 %v3675_v47  ;;  %v3630_v61 = vld [vmem:[%s4651_s5 + $0x70] sm:$0xff]   ;;  %v3632_v5 = vld [vmem:[%s4651_s5 + $0x78] sm:$0xff]  }
 0x376   :  { %v1957_v15 = vcombine.low %v1842_v8, %v1841_v6  ;;  %v3631_v2 = vld [vmem:[%s4651_s5 + $0x30] sm:$0xff]   ;;  %v3633_v6 = vld [vmem:[%s4651_s5 + $0x38] sm:$0xff]  }
 0x377   :  { %v1964_v17 = vrot.slane %v1956_v10, %v4073_v56  ;;  %v1955_v19 = vcombine.low %v1947_v13, %v1954_v12 }
 0x378   :  { %v3213_v18 = vpop.f32.mrb[8].mxu0  ;;  %v1971_v20 = vrot.slane %v1957_v15, %v4073_v56  ;;  %3447 = vmatpush3.bf16.msra.mxu0 %v3626_v59 }
 0x379   :  { %v3214_v21 = vpop.f32.mrb[9].mxu0  ;;  %3448 = vmatprep.subr.bf16.mxu0 %v3675_v47 }
 0x37a   :  { %v3215_v22 = vadd.f32 %v3214_v21, %v3213_v18  ;;  %v3216_v23 = vpop.f32.mrb[10].mxu0  ;;  %v1972_v24 = vcombine.low %v1964_v17, %v1971_v20 }
 0x37b   :  { %v3217_v25 = vpop.f32.mrb[11].mxu0 }
 0x37c   :  { %v4353_v26 = vadd.f32 %v3215_v22, %v1955_v19  ;;  %v3218_v27 = vadd.f32 %v3217_v25, %v3216_v23  ;;  %3449 = vmatpush3.bf16.msra.mxu0 %v3629_v1  ;;  %v1503_v19 = vld [vmem:[%s4652_s11] sm:$0x3] }
 0x37d   :  { %3537 = vmatprep.subr.bf16.mxu0 %v3677_v53 }
 0x37e   :  { %v4355_v28 = vadd.f32 %v3218_v27, %v1972_v24  ;;  %v2023_v29 = vmul.f32 %v4353_v26, %v4353_v26 }
 0x380   :  { %v2016_v4 = vadd.f32 %v4355_v28, %v4353_v26  ;;  %v2024_v30 = vmul.f32 %v4355_v28, %v4355_v28 }
 0x382   :  { %v2017_v31 = vrot.slane %v2016_v4, 4  ;;  %v2025_v60 = vadd.f32 %v2024_v30, %v2023_v29 }
 0x384   :  { %v2018_v0 = vadd.f32 %v2017_v31, %v2016_v4  ;;  %v2026_v32 = vrot.slane %v2025_v60, 4 }
 0x386   :  { %v2019_v7 = vrot.slane %v2018_v0, 2  ;;  %v2027_v14 = vadd.f32 %v2026_v32, %v2025_v60 }
 0x388   :  { %v2020_v33 = vadd.f32 %v2019_v7, %v2018_v0  ;;  %v2028_v34 = vrot.slane %v2027_v14, 2 }
 0x38a   :  { %v2021_v35 = vrot.slane %v2020_v33, 1  ;;  %v2029_v36 = vadd.f32 %v2028_v34, %v2027_v14 }
 0x38c   :  { %v2030_v37 = vrot.slane %v2029_v36, 1  ;;  %v2022_v38 = vadd.f32 %v2021_v35, %v2020_v33 }
 0x38e   :  { %v2031_v39 = vadd.f32 %v2030_v37, %v2029_v36 }
 0x390   :  { %v2032_v40 = vsel %vm1330_vm3, %v2022_v38, %v2031_v39 }
 0x391   :  { %v2033_v41 = vmul.f32 0.0625, %v2032_v40 }
 0x393   :  { %3432 = vmatmul.mubr.f32.vlgmr.msra.gmra.mrb[12].mxu1 %v2033_v41 }
 0x394   :  { %3246 = vmatpush3.bf16.msra.mxu1 %v3613_v3 }
 0x395   :  { %3247 = vmatprep.subr.bf16.mxu1 %v3615_v46  ;;  %v2183_v46 = vld [vmem:[%s4653_s9 + $0x8] sm:$0xff] }
 0x398   :  { %3248 = vmatpush3.bf16.msra.mxu1 %v3616_v48 }
 0x399   :  { %3249 = vmatprep.subr.bf16.mxu1 %v3618_v50 }
 0x39c   :  { %3250 = vmatpush3.bf16.msra.mxu1 %v3619_v51 }
 0x39d   :  { %3251 = vmatprep.subr.bf16.mxu1 %v3621_v11  ;;  %v3538_v11 = vpack.c.bf16 %v2183_v46, %v2182_v45 }
 0x3a0   :  { %3252 = vmatpush3.bf16.msra.mxu1 %v3622_v54 }
 0x3a1   :  { %3253 = vmatprep.subr.bf16.mxu1 %v3624_v57 }
 0x3a4   :  { %3254 = vmatpush3.bf16.msra.mxu1 %v3625_v58 }
 0x3a5   :  { %3255 = vmatprep.subr.bf16.mxu1 %v3627_v62 }
 0x3a8   :  { %3256 = vmatpush3.bf16.msra.mxu1 %v3628_v63 }
 0x3a9   :  { %3257 = vmatprep.subr.bf16.mxu1 %v3630_v61 }
 0x3ac   :  { %3258 = vmatpush3.bf16.msra.mxu1 %v3631_v2  ;;  %v2184_v2 = vld [vmem:[%s4653_s9 + $0x10] sm:$0xff] }
 0x3ad   :  { %3259 = vmatprep.subr.bf16.mxu1 %v3632_v5  ;;  %v2185_v5 = vld [vmem:[%s4653_s9 + $0x18] sm:$0xff] }
 0x3b0   :  { %3260 = vmatpush3.bf16.msra.mxu1 %v3633_v6  ;;  %v3541_v6 = vpack.c.bf16 %v2185_v5, %v2184_v2  ;;  %v3640_v2 = vld [vmem:[%s4654_s13 + $0xc8] sm:$0xff]  }
 0x3b1   :  { %v3641_v5 = vld [vmem:[%s4654_s13 + $0x88] sm:$0xff]  }
 0x466   :  { %v2100_v8 = vpop.f32.mrb[12].mxu1 }
 0x467   :  { %v2104_v10 = vmul.f32 %v2100_v8, %v2100_v8  ;;  %v3433_v12 = vpop.f32.mrb[13].mxu1 }
 0x469   :  { %v2106_v13 = vrot.slane %v2104_v10, 7  ;;  %v2187_v10 = vld [vmem:[%s4653_s9 + $0x28] sm:$0xff] }
 0x46b   :  { %v2108_v15 = vsub.f32 %v2100_v8, %v2106_v13  ;;  %v2188_v13 = vld [vmem:[%s4653_s9 + $0x30] sm:$0xff] }
 0x46d   :  { %v2109_v17 = vadd.f32 1e-05, %v2108_v15  ;;  %v2189_v15 = vld [vmem:[%s4653_s9 + $0x38] sm:$0xff] }
 0x46f   :  { %3668 = vrsqrt.f32 %v2109_v17  ;;  %v3547_v17 = vpack.c.bf16 %v2189_v15, %v2188_v13  ;;  %v3646_v13 = vld [vmem:[%s4654_s13 + $0x58] sm:$0xff]  }
 0x470   :  { %v3647_v15 = vld [vmem:[%s4654_s13 + $0x18] sm:$0xff]  }
 0x479   :  { %v3669_v18 = vpop.eup %3668 }
 0x47a   :  { %v2112_v20 = vrot.slane %v3669_v18, 1  ;;  %v2190_v18 = vld [vmem:[%s4653_s9 + $0x40] sm:$0xff] }
 0x47c   :  { %v2114_v21 = vmul.f32 %v2112_v20, %v1503_v19 }
 0x47e   :  { %v2115_v22 = vmul.f32 %v2114_v21, %v2100_v8  ;;  %v2123_v24 = vrot.slane %v2114_v21, %v4250_v9  ;;  %v2186_v8 = vld [vmem:[%s4653_s9 + $0x20] sm:$0xff]  ;;  %v2192_v21 = vld [vmem:[%s4653_s9 + $0x50] sm:$0xff] }
 0x47f   :  { %v3544_v12 = vpack.c.bf16 %v2187_v10, %v2186_v8  ;;  %v3643_v8 = vld [vmem:[%s4654_s13 + $0x10] sm:$0xff]  }
 0x480   :  { %v2117_v23 = vrot.slane %v2115_v22, 7  ;;  %v2124_v27 = vmul.f32 %v2123_v24, %v4353_v26  ;;  %v2125_v29 = vmul.f32 %v2123_v24, %v4355_v28  ;;  %v2193_v22 = vld [vmem:[%s4653_s9 + $0x58] sm:$0xff]  ;;  %v2194_v24 = vld [vmem:[%s4653_s9 + $0x60] sm:$0xff]  ;;  %v3644_v10 = vld [vmem:[%s4654_s13 + $0xd0] sm:$0xff]  }
 0x482   :  { %v2119_v25 = vsub.f32 %v1503_v19, %v2117_v23  ;;  %v2191_v19 = vld [vmem:[%s4653_s9 + $0x48] sm:$0xff]  ;;  %v3553_v23 = vpack.c.bf16 %v2193_v22, %v2192_v21  ;;  %v3652_v21 = vld [vmem:[%s4654_s13 + $0xe0] sm:$0xff]  }
 0x483   :  { %v3550_v20 = vpack.c.bf16 %v2191_v19, %v2190_v18  ;;  %v3649_v18 = vld [vmem:[%s4654_s13 + $0x98] sm:$0xff]   ;;  %v3650_v19 = vld [vmem:[%s4654_s13 + $0x60] sm:$0xff]  }
 0x484   :  { %v2129_v4 = vrot.slane %v2119_v25, %v4254_v16  ;;  %v2195_v25 = vld [vmem:[%s4653_s9 + $0x68] sm:$0xff]  ;;  %v3653_v22 = vld [vmem:[%s4654_s13 + $0xa0] sm:$0xff]  }
 0x486   :  { %v2130_v30 = vadd.f32 %v2129_v4, %v2124_v27  ;;  %v2131_v31 = vadd.f32 %v2129_v4, %v2125_v29  ;;  %v3556_v27 = vpack.c.bf16 %v2195_v25, %v2194_v24  ;;  %v2196_v29 = vld [vmem:[%s4653_s9 + $0x70] sm:$0xff]  ;;  %v2197_v4 = vld [vmem:[%s4653_s9 + $0x78] sm:$0xff]  ;;  %v3655_v24 = vld [vmem:[%s4654_s13 + $0x28] sm:$0xff]  }
 0x487   :  { %v3656_v25 = vld [vmem:[%s4654_s13 + $0xe8] sm:$0xff]  }
 0x488   :  { %v2132_v60 = vmax.f32 %v2130_v30, 0.0  ;;  %v2133_v0 = vmax.f32 %v2131_v31, 0.0  ;;  %v3559_v30 = vpack.c.bf16 %v2197_v4, %v2196_v29  ;;  %v3658_v29 = vld [vmem:[%s4654_s13 + $0x70] sm:$0xff]  }
 0x489   :  { %v3659_v4 = vld [vmem:[%s4654_s13 + $0x30] sm:$0xff]  }
 0x48a   :  { %v2201_v32 = vcombine.high %v2132_v60, %v2132_v60  ;;  %v2208_v7 = vrot.slane %v2132_v60, %v4073_v56  ;;  %v2218_v14 = vcombine.high %v2133_v0, %v2133_v0  ;;  %v2225_v33 = vrot.slane %v2133_v0, %v4073_v56 }
 0x48c   :  { %v2215_v34 = vrot.slane %v2201_v32, %v4073_v56  ;;  %v2232_v35 = vrot.slane %v2218_v14, %v4073_v56  ;;  %v2216_v36 = vcombine.high %v2208_v7, %v2208_v7  ;;  %v2233_v26 = vcombine.high %v2225_v33, %v2225_v33 }
 0x48e   :  { %v3104_v37 = vcombine.high %v2208_v7, %v2215_v34  ;;  %v3105_v28 = vcombine.high %v2225_v33, %v2232_v35  ;;  %v2217_v38 = vcombine.high %v2215_v34, %v2215_v34  ;;  %v2234_v39 = vcombine.high %v2232_v35, %v2232_v35 }
 0x48f   :  { %v2235_v40 = vcombine.low %v2208_v7, %v2216_v36  ;;  %v2251_v41 = vcombine.low %v2225_v33, %v2233_v26 }
 0x490   :  { %v2297_v42 = vrot.slane %v3104_v37, %v4073_v56  ;;  %v2304_v43 = vrot.slane %v3105_v28, %v4073_v56  ;;  %v2243_v44 = vcombine.low %v2215_v34, %v2217_v38  ;;  %v2259_v3 = vcombine.low %v2232_v35, %v2234_v39 }
 0x491   :  { %v2242_v48 = vrot.slane %v2235_v40, %v4073_v56  ;;  %v2258_v51 = vrot.slane %v2251_v41, %v4073_v56 }
 0x492   :  { %v2305_v49 = vcombine.low %v2297_v42, %v2304_v43  ;;  %v2250_v50 = vrot.slane %v2243_v44, %v4073_v56  ;;  %v2266_v52 = vrot.slane %v2259_v3, %v4073_v56 }
 0x494   :  { %v2307_v54 = vpack.c.bf16 %v2305_v49, %v2305_v49  ;;  %v2267_v55 = vcombine.low %v2242_v48, %v2250_v50  ;;  %v2268_v57 = vcombine.low %v2258_v51, %v2266_v52 }
 0x496   :  { %3451 = vmatmul.mubr.bf16.vlgmr.msra.gmra.mrb[12].mxu0 %v2307_v54  ;;  %v2275_v58 = vrot.slane %v2267_v55, %v4073_v56  ;;  %v2282_v59 = vrot.slane %v2268_v57, %v4073_v56 }
 0x497   :  { %3539 = vmatpush3.bf16.msra.mxu0 %v3538_v11  ;;  %3486 = vmatprep.mubr.msk.f32.mxu0 %vm3678_vm2, %v3675_v47 }
 0x498   :  { %v2284_v62 = vcombine.high %v2275_v58, %v2282_v59  ;;  %v2283_v63 = vcombine.low %v2275_v58, %v2282_v59  ;;  %3540 = vmatprep.subr.bf16.mxu0 %v3677_v53  ;;  %v3634_v58 = vld [vmem:[%s4654_s13 + $0x40] sm:$0xff]  }
 0x499   :  { %v3635_v59 = vld [vmem:[%s4654_s13] sm:$0xff]   ;;  %3284 = vmatprep.subr.bf16.mxu1 %v3634_v58 }
 0x49a   :  { %v2288_v1 = vpack.c.bf16 %v2284_v62, %v2284_v62  ;;  %v2287_v61 = vpack.c.bf16 %v2283_v63, %v2283_v63  ;;  %v3636_v62 = vld [vmem:[%s4654_s13 + $0xc0] sm:$0xff]  }
 0x49b   :  { %3542 = vmatpush3.bf16.msra.mxu0 %v3541_v6  ;;  %v3637_v63 = vld [vmem:[%s4654_s13 + $0x80] sm:$0xff]   ;;  %v3642_v6 = vld [vmem:[%s4654_s13 + $0x50] sm:$0xff]  }
 0x49c   :  { %2559 = vmatprep.mubr.bf16.mxu1 %v2288_v1  ;;  %3543 = vmatprep.subr.bf16.mxu0 %v3677_v53  ;;  %v3638_v1 = vld [vmem:[%s4654_s13 + $0x48] sm:$0xff]  }
 0x49d   :  { %2560 = vmatmul.mubr.bf16.vlgmr.msra.gmra.mrb[16].mxu1 %v2287_v61  ;;  %v3639_v61 = vld [vmem:[%s4654_s13 + $0x8] sm:$0xff]  }
 0x49e   :  { %3285 = vmatpush3.bf16.msra.mxu1 %v3635_v59 }
 0x49f   :  { %3545 = vmatpush3.bf16.msra.mxu0 %v3544_v12  ;;  %3286 = vmatprep.subr.bf16.mxu1 %v3638_v1  ;;  %v3645_v12 = vld [vmem:[%s4654_s13 + $0x90] sm:$0xff]  }
 0x4a0   :  { %3546 = vmatprep.subr.bf16.mxu0 %v3677_v53 }
 0x4a2   :  { %3287 = vmatpush3.bf16.msra.mxu1 %v3639_v61 }
 0x4a3   :  { %3548 = vmatpush3.bf16.msra.mxu0 %v3547_v17  ;;  %3288 = vmatprep.subr.bf16.mxu1 %v3642_v6  ;;  %v3648_v17 = vld [vmem:[%s4654_s13 + $0xd8] sm:$0xff]  }
 0x4a4   :  { %3549 = vmatprep.subr.bf16.mxu0 %v3677_v53 }
 0x4a6   :  { %3289 = vmatpush3.bf16.msra.mxu1 %v3643_v8 }
 0x4a7   :  { %3551 = vmatpush3.bf16.msra.mxu0 %v3550_v20  ;;  %3290 = vmatprep.subr.bf16.mxu1 %v3646_v13  ;;  %v3651_v20 = vld [vmem:[%s4654_s13 + $0x20] sm:$0xff]  }
 0x4a8   :  { %3552 = vmatprep.subr.bf16.mxu0 %v3677_v53 }
 0x4aa   :  { %3291 = vmatpush3.bf16.msra.mxu1 %v3647_v15 }
 0x4ab   :  { %3554 = vmatpush3.bf16.msra.mxu0 %v3553_v23  ;;  %3292 = vmatprep.subr.bf16.mxu1 %v3650_v19  ;;  %v3654_v23 = vld [vmem:[%s4654_s13 + $0x68] sm:$0xff]  }
 0x4ac   :  { %3555 = vmatprep.subr.bf16.mxu0 %v3677_v53 }
 0x4ae   :  { %3293 = vmatpush3.bf16.msra.mxu1 %v3651_v20 }
 0x4af   :  { %3557 = vmatpush3.bf16.msra.mxu0 %v3556_v27  ;;  %3294 = vmatprep.subr.bf16.mxu1 %v3654_v23  ;;  %v3657_v27 = vld [vmem:[%s4654_s13 + $0xa8] sm:$0xff]  }
 0x4b0   :  { %3558 = vmatprep.subr.bf16.mxu0 %v3677_v53 }
 0x4b2   :  { %3295 = vmatpush3.bf16.msra.mxu1 %v3655_v24 }
 0x4b3   :  { %3560 = vmatpush3.bf16.msra.mxu0 %v3559_v30  ;;  %3296 = vmatprep.subr.bf16.mxu1 %v3658_v29  ;;  %v3660_v30 = vld [vmem:[%s4654_s13 + $0xf0] sm:$0xff]  }
 0x4b4   :  { %3306 = vmatprep.subr.bf16.mxu0 %v3636_v62 }
 0x4b6   :  { %3297 = vmatpush3.bf16.msra.mxu1 %v3659_v4 }
 0x569   :  { %v2390_v31 = vpop.f32.mrb[12].mxu0 }
 0x56a   :  { %v2397_v60 = vcombine.high %v2390_v31, %v2390_v31  ;;  %v2404_v0 = vrot.slane %v2390_v31, %v4073_v56  ;;  %v3452_v32 = vpop.f32.mrb[13].mxu0  ;;  %v3661_v31 = vld [vmem:[%s4654_s13 + $0xb0] sm:$0xff]  }
 0x56b   :  { %v2393_v7 = vpop.f32.mrb[14].mxu0  ;;  %v3664_v32 = vld [vmem:[%s4654_s13 + $0xf8] sm:$0xff]  }
 0x56c   :  { %v2411_v14 = vrot.slane %v2397_v60, %v4073_v56  ;;  %v2412_v33 = vcombine.high %v2404_v0, %v2404_v0  ;;  %v2509_v34 = vcombine.low %v3675_v47, %v2404_v0  ;;  %v3453_v35 = vpop.f32.mrb[15].mxu0  ;;  %v3662_v60 = vld [vmem:[%s4654_s13 + $0x78] sm:$0xff]  }
 0x56d   :  { %v3663_v0 = vld [vmem:[%s4654_s13 + $0x38] sm:$0xff]   ;;  %3298 = vmatprep.subr.bf16.mxu1 %v3662_v60 }
 0x56e   :  { %v2510_v36 = vcombine.low %v2412_v33, %v2411_v14  ;;  %v2517_v26 = vrot.slane %v2509_v34, %v4073_v56  ;;  %3299 = vmatpush3.bf16.msra.mxu1 %v3663_v0  ;;  %v3665_v7 = vld [vmem:[%s4654_s13 + $0xb8] sm:$0xff]  }
 0x570   :  { %v3261_v37 = vpop.f32.mrb[16].mxu1  ;;  %v2524_v28 = vrot.slane %v2510_v36, %v4073_v56 }
 0x571   :  { %v3262_v53 = vpop.f32.mrb[17].mxu1 }
 0x572   :  { %v2525_v38 = vcombine.low %v2517_v26, %v2524_v28  ;;  %v3263_v39 = vadd.f32 %v3262_v53, %v3261_v37  ;;  %v3264_v40 = vpop.f32.mrb[18].mxu1  ;;  %v2198_v28 = vld [vmem:[%s4655_s12] sm:$0x3] }
 0x573   :  { %v3265_v41 = vpop.f32.mrb[19].mxu1 }
 0x574   :  { %v4525_v42 = vadd.f32 %v3263_v39, %v2525_v38 }
 0x576   :  { %v2567_v43 = vrot.slane %v4525_v42, 4  ;;  %v2573_v44 = vmul.f32 %v4525_v42, %v4525_v42 }
 0x578   :  { %v2568_v47 = vadd.f32 %v2567_v43, %v4525_v42  ;;  %v2574_v3 = vrot.slane %v2573_v44, 4 }
 0x57a   :  { %v2569_v45 = vrot.slane %v2568_v47, 2  ;;  %v2575_v46 = vadd.f32 %v2574_v3, %v2573_v44 }
 0x57c   :  { %v2570_v48 = vadd.f32 %v2569_v45, %v2568_v47  ;;  %v2576_v49 = vrot.slane %v2575_v46, 2 }
 0x57e   :  { %v2571_v50 = vrot.slane %v2570_v48, 1  ;;  %v2577_v51 = vadd.f32 %v2576_v49, %v2575_v46 }
 0x580   :  { %v2578_v52 = vrot.slane %v2577_v51, 1  ;;  %v2572_v11 = vadd.f32 %v2571_v50, %v2570_v48 }
 0x582   :  { %v2579_v54 = vadd.f32 %v2578_v52, %v2577_v51 }
 0x584   :  { %v2580_v55 = vsel %vm1330_vm3, %v2572_v11, %v2579_v54 }
 0x585   :  { %v2581_v57 = vmul.f32 0.125, %v2580_v55 }
 0x587   :  { %3487 = vmatmul.mubr.f32.vlgmr.msra.gmra.mrb[6].mxu0 %v2581_v57 }
 0x588   :  { %3307 = vmatpush3.bf16.msra.mxu0 %v3637_v63 }
 0x589   :  { %3308 = vmatprep.subr.bf16.mxu0 %v3640_v2 }
 0x58c   :  { %3309 = vmatpush3.bf16.msra.mxu0 %v3641_v5 }
 0x58d   :  { %3310 = vmatprep.subr.bf16.mxu0 %v3644_v10 }
 0x590   :  { %3311 = vmatpush3.bf16.msra.mxu0 %v3645_v12 }
 0x591   :  { %3312 = vmatprep.subr.bf16.mxu0 %v3648_v17 }
 0x594   :  { %3313 = vmatpush3.bf16.msra.mxu0 %v3649_v18 }
 0x595   :  { %3314 = vmatprep.subr.bf16.mxu0 %v3652_v21 }
 0x598   :  { %3315 = vmatpush3.bf16.msra.mxu0 %v3653_v22 }
 0x599   :  { %3316 = vmatprep.subr.bf16.mxu0 %v3656_v25 }
 0x59c   :  { %3317 = vmatpush3.bf16.msra.mxu0 %v3657_v27 }
 0x59d   :  { %3318 = vmatprep.subr.bf16.mxu0 %v3660_v30 }
 0x5a0   :  { %3319 = vmatpush3.bf16.msra.mxu0 %v3661_v31 }
 0x5a1   :  { %3320 = vmatprep.subr.bf16.mxu0 %v3664_v32 }
 0x5a4   :  { %3321 = vmatpush3.bf16.msra.mxu0 %v3665_v7 }
 0x65a   :  { %v2648_v14 = vpop.f32.mrb[6].mxu0 }
 0x65b   :  { %v2652_v33 = vmul.f32 %v2648_v14, %v2648_v14  ;;  %v3488_v34 = vpop.f32.mrb[7].mxu0 }
 0x65d   :  { %v2654_v35 = vrot.slane %v2652_v33, 7 }
 0x65f   :  { %v2656_v36 = vsub.f32 %v2648_v14, %v2654_v35 }
 0x661   :  { %v2657_v26 = vadd.f32 1e-05, %v2656_v36 }
 0x663   :  { %3670 = vrsqrt.f32 %v2657_v26 }
 0x66d   :  { %v3671_v37 = vpop.eup %3670 }
 0x66e   :  { %v2660_v53 = vrot.slane %v3671_v37, 1 }
 0x670   :  { %v2662_v38 = vmul.f32 %v2660_v53, %v2198_v28 }
 0x672   :  { %v2663_v39 = vmul.f32 %v2662_v38, %v2648_v14  ;;  %v2671_v41 = vrot.slane %v2662_v38, %v4250_v9 }
 0x674   :  { %v2665_v40 = vrot.slane %v2663_v39, 7  ;;  %v2672_v44 = vmul.f32 %v2671_v41, %v4525_v42 }
 0x676   :  { %v2667_v43 = vsub.f32 %v2198_v28, %v2665_v40 }
 0x678   :  { %v2676_v47 = vrot.slane %v2667_v43, %v4254_v16  ;;  %v3130_v16 = vld [vmem:[%s4656_s14] ss:$0 sm:$0xff] }
 0x67a   :  { %v2677_v3 = vadd.f32 %v2676_v47, %v2672_v44 }
 0x67c   :  { %v2678_v45 = vmax.f32 %v2677_v3, 0.0 }
 0x67e   :  { %v2687_v46 = vrot.slane %v2678_v45, %v4073_v56  ;;  %v2680_v48 = vcombine.high %v2678_v45, %v2678_v45 }
 0x680   :  { %v2695_v49 = vcombine.high %v2687_v46, %v2687_v46  ;;  %v2694_v50 = vrot.slane %v2680_v48, %v4073_v56  ;;  %v2701_v11 = vpack.c.bf16 %v2687_v46, %v2687_v46 }
 0x682   :  { %v2702_v51 = vpack.c.bf16 %v2695_v49, %v2695_v49  ;;  %v2696_v52 = vcombine.high %v2694_v50, %v2694_v50  ;;  %v2703_v9 = vpack.c.bf16 %v2694_v50, %v2694_v50 }
 0x684   :  { %3000 = vmatprep.mubr.bf16.mxu1 %v2702_v51  ;;  %v2704_v54 = vpack.c.bf16 %v2696_v52, %v2696_v52 }
 0x685   :  { %3001 = vmatmul.mubr.bf16.vlgmr.msra.gmra.mrb[20].mxu1 %v2701_v11 }
 0x686   :  { %3040 = vmatprep.mubr.bf16.mxu0 %v2704_v54 }
 0x687   :  { %3041 = vmatmul.mubr.bf16.vlgmr.msra.gmra.mrb[16].mxu0 %v2703_v9 }
 0x758   :  { %v3300_v42 = vpop.f32.mrb[20].mxu1 }
 0x759   :  { %v3301_v55 = vpop.f32.mrb[21].mxu1 }
 0x75a   :  { %v3302_v57 = vadd.f32 %v3301_v55, %v3300_v42  ;;  %v3303_v58 = vpop.f32.mrb[22].mxu1  ;;  %v3322_v59 = vpop.f32.mrb[16].mxu0 }
 0x75b   :  { %v3304_v62 = vpop.f32.mrb[23].mxu1  ;;  %v3323_v56 = vpop.f32.mrb[17].mxu0 }
 0x75c   :  { %v3003_v63 = vadd.f32 %v3302_v57, %v3130_v16  ;;  %v3324_v1 = vadd.f32 %v3323_v56, %v3322_v59  ;;  %v3325_v61 = vpop.f32.mrb[18].mxu0 }
 0x75d   :  { %v3326_v2 = vpop.f32.mrb[19].mxu0 }
 0x75e   :  { %v3043_v5 = vadd.f32 %v3324_v1, %v3003_v63 }
 0x760   :  { %3049 = vst.msk [vmem:[%s4657_s15] sm:$0x3] %vm3048_vm4, %v3043_v5 }

</bundles_post_ra>
